<compile_context>
chip_gen: v7x
topology: tpu7x:2x2x1
jax: 0.10.0
libtpu: 0.0.40
codegen_flags: <defaults>
</compile_context>

<pallas_src>
import functools

import jax
import jax.numpy as jnp
from jax import lax
from jax.experimental import pallas as pl
from jax.experimental.pallas import tpu as pltpu


def _resblock_kernel(x_ref, w1_ref, w2_ref, mask_ref, out_ref, *, H, W, B_blk):
    # x_ref:    (B_blk, C, HW)   channels on sublanes, flattened spatial on lanes
    # w1_ref:   (C, 9C)          fused conv1 weights  w[co, t*C + ci], t = di*3+dj
    # w2_ref:   (C, 9C)          fused conv2 weights
    # mask_ref: (9C, HW)         0/1 boundary masks, per-tap block of C rows
    # out_ref:  (B_blk, C, HW)
    HW = H * W
    taps = [(di - 1, dj - 1) for di in range(3) for dj in range(3)]

    mask = mask_ref[...]                                       # loaded once, reused

    def conv3x3(src, w_ref):
        # Stack the 9 shifted views along sublanes -> one K=9C matmul.
        slabs = []
        for (dy, dx) in taps:
            k = dy * W + dx
            if k == 0:
                slabs.append(src)
            else:
                # shifted[ci, s] = src[ci, (s + k) mod HW]; wrapped lanes zeroed by mask
                slabs.append(pltpu.roll(src, shift=(-k) % HW, axis=1))
        stack = jnp.concatenate(slabs, axis=0) * mask           # (9C, HW)
        return jnp.dot(w_ref[...], stack,
                       preferred_element_type=jnp.float32)      # (C, HW)

    for b in range(B_blk):                                      # small, unrolled
        h1 = jnp.maximum(conv3x3(x_ref[b], w1_ref), 0.0)        # conv1 + ReLU (VMEM only)
        res = conv3x3(h1, w2_ref)                               # conv2 (no ReLU)
        out_ref[b] = jnp.maximum(x_ref[b] + res, 0.0)           # residual add + ReLU


def _pick_batches_per_block(N):
    """Largest divisor of N keeping >=2 grid steps (v7x 2-TC sharding) when N>=2."""
    if N <= 1:
        return max(N, 1)
    for b in range(N // 2, 0, -1):
        if N % b == 0:
            return b
    return 1


@jax.jit
def resblock_forward(x_nchw, w1, w2):
    """ResBLOCK forward. x: (N, C, H, W); w1, w2: (C, C, 3, 3) PyTorch OIHW, bias=False."""
    N, C, H, W = x_nchw.shape
    HW = H * W
    B_blk = _pick_batches_per_block(N)
    n_steps = N // B_blk

    x_flat = x_nchw.reshape(N, C, HW)                           # free contiguous reshape

    # Fused weights: w_f[co, (di*3+dj)*C + ci] = w[co, ci, di, dj]
    w1_f = jnp.transpose(w1, (0, 2, 3, 1)).reshape(C, 9 * C)
    w2_f = jnp.transpose(w2, (0, 2, 3, 1)).reshape(C, 9 * C)

    # Precomputed boundary masks, one C-row block per tap (constant per (C,H,W)).
    s = jnp.arange(HW, dtype=jnp.int32)
    hh, ww = s // W, s % W
    blocks = []
    for di in range(3):
        for dj in range(3):
            dy, dx = di - 1, dj - 1
            valid = ((hh + dy >= 0) & (hh + dy < H) &
                     (ww + dx >= 0) & (ww + dx < W)).astype(jnp.float32)   # (HW,)
            blocks.append(jnp.broadcast_to(valid[None, :], (C, HW)))
    mask9 = jnp.concatenate(blocks, axis=0)                     # (9C, HW)

    y_flat = pl.pallas_call(
        functools.partial(_resblock_kernel, H=H, W=W, B_blk=B_blk),
        out_shape=jax.ShapeDtypeStruct((N, C, HW), jnp.float32),
        grid=(n_steps,),
        in_specs=[
            pl.BlockSpec((B_blk, C, HW), lambda n: (n, 0, 0)),
            pl.BlockSpec((C, 9 * C), lambda n: (0, 0)),
            pl.BlockSpec((C, 9 * C), lambda n: (0, 0)),
            pl.BlockSpec((9 * C, HW), lambda n: (0, 0)),
        ],
        out_specs=pl.BlockSpec((B_blk, C, HW), lambda n: (n, 0, 0)),
        compiler_params=pltpu.CompilerParams(
            dimension_semantics=("parallel",),                  # batch blocks -> v7x 2 TCs
        ),
    )(x_flat, w1_f, w2_f, mask9)

    return y_flat.reshape(N, C, H, W)


# ---------------- Pure-JAX reference (verification only) ----------------
def _resblock_reference(x, w1, w2):
    def conv(v, w):
        return lax.conv_general_dilated(
            v, w, window_strides=(1, 1), padding=((1, 1), (1, 1)),
            dimension_numbers=("NCHW", "OIHW", "NCHW"),
            precision=lax.Precision.HIGHEST)
    h = jnp.maximum(conv(x, w1), 0.0)       # BasicConv(relu=True)
    res = conv(h, w2)                       # BasicConv(relu=False)
    return jnp.maximum(x + res, 0.0)        # residual + ReLU


if __name__ == "__main__":
    N, C, H, W = 2, 32, 16, 16              # n_feat = 32
    key = jax.random.PRNGKey(0)
    k1, k2, k3 = jax.random.split(key, 3)
    x = jax.random.normal(k1, (N, C, H, W), dtype=jnp.float32)
    w1 = jax.random.normal(k2, (C, C, 3, 3), dtype=jnp.float32) * 0.1  # Conv2d(C, C, 3, pad=1, bias=False)
    w2 = jax.random.normal(k3, (C, C, 3, 3), dtype=jnp.float32) * 0.1

    y = resblock_forward(x, w1, w2)
    y = jax.block_until_ready(y)

    y_ref = _resblock_reference(x, w1, w2)
    assert y.shape == (N, C, H, W)
    max_err = float(jnp.max(jnp.abs(y - y_ref)))
    assert jnp.allclose(y, y_ref, rtol=1e-3, atol=1e-3), max_err
    print("KERNEL_OK")
</pallas_src>

<mosaic_0001>
module attributes {stable_mosaic.version = 11 : i64} {
  func.func @_resblock_kernel(%arg0: i32, %arg1: memref<1x32x256xf32, #tpu.memory_space<vmem>>, %arg2: memref<32x288xf32, #tpu.memory_space<vmem>>, %arg3: memref<32x288xf32, #tpu.memory_space<vmem>>, %arg4: memref<288x256xf32, #tpu.memory_space<vmem>>, %arg5: memref<1x32x256xf32, #tpu.memory_space<vmem>>) attributes {dimension_semantics = [#tpu.dimension_semantics<parallel>], iteration_bounds = array<i64: 2>, scalar_prefetch = 0 : i64, scratch_operands = 0 : i64, tpu.core_type = #tpu.core_type<tc>, window_params = [{transform_indices = @transform_0, window_bounds = array<i64: 1, 32, 256>}, {pipeline_mode = #tpu.pipeline_mode<synchronous>, transform_indices = @transform_1, window_bounds = array<i64: 32, 288>}, {pipeline_mode = #tpu.pipeline_mode<synchronous>, transform_indices = @transform_2, window_bounds = array<i64: 32, 288>}, {pipeline_mode = #tpu.pipeline_mode<synchronous>, transform_indices = @transform_3, window_bounds = array<i64: 288, 256>}, {transform_indices = @transform_4, window_bounds = array<i64: 1, 32, 256>}]} {
    %c0 = arith.constant 0 : index
    %c0_0 = arith.constant 0 : index
    %0 = vector.load %arg4[%c0, %c0_0] : memref<288x256xf32, #tpu.memory_space<vmem>>, vector<288x256xf32>
    %c0_1 = arith.constant 0 : index
    %c0_2 = arith.constant 0 : index
    %c0_3 = arith.constant 0 : index
    %1 = vector.load %arg1[%c0_1, %c0_2, %c0_3] : memref<1x32x256xf32, #tpu.memory_space<vmem>>, vector<1x32x256xf32>
    %2 = vector.shape_cast %1 : vector<1x32x256xf32> to vector<32x256xf32>
    %c17_i32 = arith.constant 17 : i32
    %3 = tpu.dynamic_rotate %2 by %c17_i32 dim 1 : vector<32x256xf32>, i32 -> vector<32x256xf32>
    %c16_i32 = arith.constant 16 : i32
    %4 = tpu.dynamic_rotate %2 by %c16_i32 dim 1 : vector<32x256xf32>, i32 -> vector<32x256xf32>
    %c15_i32 = arith.constant 15 : i32
    %5 = tpu.dynamic_rotate %2 by %c15_i32 dim 1 : vector<32x256xf32>, i32 -> vector<32x256xf32>
    %c1_i32 = arith.constant 1 : i32
    %6 = tpu.dynamic_rotate %2 by %c1_i32 dim 1 : vector<32x256xf32>, i32 -> vector<32x256xf32>
    %c255_i32 = arith.constant 255 : i32
    %7 = tpu.dynamic_rotate %2 by %c255_i32 dim 1 : vector<32x256xf32>, i32 -> vector<32x256xf32>
    %c241_i32 = arith.constant 241 : i32
    %8 = tpu.dynamic_rotate %2 by %c241_i32 dim 1 : vector<32x256xf32>, i32 -> vector<32x256xf32>
    %c240_i32 = arith.constant 240 : i32
    %9 = tpu.dynamic_rotate %2 by %c240_i32 dim 1 : vector<32x256xf32>, i32 -> vector<32x256xf32>
    %c239_i32 = arith.constant 239 : i32
    %10 = tpu.dynamic_rotate %2 by %c239_i32 dim 1 : vector<32x256xf32>, i32 -> vector<32x256xf32>
    %11 = tpu.concatenate %3, %4, %5, %6, %2, %7, %8, %9, %10 in 0 : vector<32x256xf32>, vector<32x256xf32>, vector<32x256xf32>, vector<32x256xf32>, vector<32x256xf32>, vector<32x256xf32>, vector<32x256xf32>, vector<32x256xf32>, vector<32x256xf32> -> vector<288x256xf32>
    %12 = arith.mulf %11, %0 : vector<288x256xf32>
    %c0_4 = arith.constant 0 : index
    %c0_5 = arith.constant 0 : index
    %13 = vector.load %arg2[%c0_4, %c0_5] : memref<32x288xf32, #tpu.memory_space<vmem>>, vector<32x288xf32>
    %cst = arith.constant dense<0.000000e+00> : vector<32x256xf32>
    %14 = tpu.matmul %13, %12, %cst {dimension_numbers = #tpu.dot_dimension_numbers<[1], [0], [0], [1], [0, 0, 1, 1], [], []>} : vector<32x288xf32>, vector<288x256xf32>, vector<32x256xf32> -> vector<32x256xf32>
    %cst_6 = arith.constant 0.000000e+00 : f32
    %15 = vector.broadcast %cst_6 : f32 to vector<32x256xf32>
    %16 = arith.maximumf %14, %15 : vector<32x256xf32>
    %c17_i32_7 = arith.constant 17 : i32
    %17 = tpu.dynamic_rotate %16 by %c17_i32_7 dim 1 : vector<32x256xf32>, i32 -> vector<32x256xf32>
    %c16_i32_8 = arith.constant 16 : i32
    %18 = tpu.dynamic_rotate %16 by %c16_i32_8 dim 1 : vector<32x256xf32>, i32 -> vector<32x256xf32>
    %c15_i32_9 = arith.constant 15 : i32
    %19 = tpu.dynamic_rotate %16 by %c15_i32_9 dim 1 : vector<32x256xf32>, i32 -> vector<32x256xf32>
    %c1_i32_10 = arith.constant 1 : i32
    %20 = tpu.dynamic_rotate %16 by %c1_i32_10 dim 1 : vector<32x256xf32>, i32 -> vector<32x256xf32>
    %c255_i32_11 = arith.constant 255 : i32
    %21 = tpu.dynamic_rotate %16 by %c255_i32_11 dim 1 : vector<32x256xf32>, i32 -> vector<32x256xf32>
    %c241_i32_12 = arith.constant 241 : i32
    %22 = tpu.dynamic_rotate %16 by %c241_i32_12 dim 1 : vector<32x256xf32>, i32 -> vector<32x256xf32>
    %c240_i32_13 = arith.constant 240 : i32
    %23 = tpu.dynamic_rotate %16 by %c240_i32_13 dim 1 : vector<32x256xf32>, i32 -> vector<32x256xf32>
    %c239_i32_14 = arith.constant 239 : i32
    %24 = tpu.dynamic_rotate %16 by %c239_i32_14 dim 1 : vector<32x256xf32>, i32 -> vector<32x256xf32>
    %25 = tpu.concatenate %17, %18, %19, %20, %16, %21, %22, %23, %24 in 0 : vector<32x256xf32>, vector<32x256xf32>, vector<32x256xf32>, vector<32x256xf32>, vector<32x256xf32>, vector<32x256xf32>, vector<32x256xf32>, vector<32x256xf32>, vector<32x256xf32> -> vector<288x256xf32>
    %26 = arith.mulf %25, %0 : vector<288x256xf32>
    %c0_15 = arith.constant 0 : index
    %c0_16 = arith.constant 0 : index
    %27 = vector.load %arg3[%c0_15, %c0_16] : memref<32x288xf32, #tpu.memory_space<vmem>>, vector<32x288xf32>
    %cst_17 = arith.constant dense<0.000000e+00> : vector<32x256xf32>
    %28 = tpu.matmul %27, %26, %cst_17 {dimension_numbers = #tpu.dot_dimension_numbers<[1], [0], [0], [1], [0, 0, 1, 1], [], []>} : vector<32x288xf32>, vector<288x256xf32>, vector<32x256xf32> -> vector<32x256xf32>
    %c0_18 = arith.constant 0 : index
    %c0_19 = arith.constant 0 : index
    %c0_20 = arith.constant 0 : index
    %29 = vector.load %arg1[%c0_18, %c0_19, %c0_20] : memref<1x32x256xf32, #tpu.memory_space<vmem>>, vector<1x32x256xf32>
    %30 = vector.shape_cast %29 : vector<1x32x256xf32> to vector<32x256xf32>
    %31 = arith.addf %30, %28 : vector<32x256xf32>
    %cst_21 = arith.constant 0.000000e+00 : f32
    %32 = vector.broadcast %cst_21 : f32 to vector<32x256xf32>
    %33 = arith.maximumf %31, %32 : vector<32x256xf32>
    %c0_22 = arith.constant 0 : index
    %c0_23 = arith.constant 0 : index
    %c0_24 = arith.constant 0 : index
    %34 = vector.load %arg5[%c0_22, %c0_23, %c0_24] : memref<1x32x256xf32, #tpu.memory_space<vmem>>, vector<1x32x256xf32>
    %35 = vector.shape_cast %34 : vector<1x32x256xf32> to vector<32x256xf32>
    %36 = vector.shape_cast %33 : vector<32x256xf32> to vector<1x32x256xf32>
    tpu.vector_store %arg5[%c0_22, %c0_23, %c0_24], %36 {strides = array<i32>} : memref<1x32x256xf32, #tpu.memory_space<vmem>>, vector<1x32x256xf32>,
    return
  }
  func.func @transform_0(%arg0: i32) -> (i32, i32, i32) {
    %c0_i32 = arith.constant 0 : i32
    %c0_i32_0 = arith.constant 0 : i32
    %c0_i32_1 = arith.constant 0 : i32
    return %arg0, %c0_i32, %c0_i32_0 : i32, i32, i32
  }
  func.func @transform_1(%arg0: i32) -> (i32, i32) {
    %c0_i32 = arith.constant 0 : i32
    %c0_i32_0 = arith.constant 0 : i32
    %c0_i32_1 = arith.constant 0 : i32
    return %c0_i32, %c0_i32_0 : i32, i32
  }
  func.func @transform_2(%arg0: i32) -> (i32, i32) {
    %c0_i32 = arith.constant 0 : i32
    %c0_i32_0 = arith.constant 0 : i32
    %c0_i32_1 = arith.constant 0 : i32
    return %c0_i32, %c0_i32_0 : i32, i32
  }
  func.func @transform_3(%arg0: i32) -> (i32, i32) {
    %c0_i32 = arith.constant 0 : i32
    %c0_i32_0 = arith.constant 0 : i32
    %c0_i32_1 = arith.constant 0 : i32
    return %c0_i32, %c0_i32_0 : i32, i32
  }
  func.func @transform_4(%arg0: i32) -> (i32, i32, i32) {
    %c0_i32 = arith.constant 0 : i32
    %c0_i32_0 = arith.constant 0 : i32
    %c0_i32_1 = arith.constant 0 : i32
    return %arg0, %c0_i32, %c0_i32_0 : i32, i32, i32
  }
}

</mosaic_0001>

<bundles_post_ra>
// kernel: resblock_forward.1
= control target key start
LH: loop header
LB: loop body
LE: loop exit
PB: predicated region body
PF: predicated region fallthrough
CT: control target
= control target key end

     0   :  { %s1556_s15 = smov 0   ;;  %s2840_s0 = inlined_call_operand.vmem [shape: f32[2,32,256], index: 0, kind: input, shape index: {}]   ;;  %s2841_s1 = inlined_call_operand.vmem [shape: f32[32,288], index: 1, kind: input, shape index: {}]   ;;  %s2842_s2 = inlined_call_operand.vmem [shape: f32[32,288], index: 2, kind: input, shape index: {}]   ;;  %s2843_s3 = inlined_call_operand.vmem [shape: f32[288,256], index: 3, kind: input, shape index: {}]   ;;  %s2844_s4 = inlined_call_operand.vmem [shape: f32[2,32,256], index: 4, kind: output, shape index: {}]  }
   0x1 LB: > { %s1308_s16 = sadd.s32 4294967295, %s1520_s15   ;;  %p1312_p0 = scmp.ge.s32.totalorder %s1520_s15, 1  ;;  %s1520_s15 = sphi %s1556_s15, %s14_s15  }
   0x2   : > { %p162_p1 = scmp.lt.s32.totalorder %s1520_s15, 3 }
   0x4   : > { %p163_p2 = pnand %p1312_p0, %p162_p1 }
   0x6   : > { %166 = sbr.rel (%p163_p2) target bundleno = 963 (0x3c3), region = 36 }
   0xd   : > { %p188_p3 = scmp.lt.s32.totalorder %s1308_s16, 1  ;;  %s1522_s21 = smov 17   ;;  %v553_v8 = vld [vmem:[%s2841_s1 + $0x8] sm:$0xff]  ;;  %v294_v9 = vlaneseq  ;;  %v1736_v16 = vld [vmem:[%s2843_s3 + $0x18] sm:$0xff]  ;;  %v1741_v17 = vld [vmem:[%s2843_s3] sm:$0xff]  ;;  %vm564_vm8 = vcmask 261120  }
   0xe   : > { %s1523_s22 = smov 16   ;;  %s1524_s23 = smov 15   ;;  %641 = vmatprep.mubr.f32.mxu0 %v553_v8  ;;  %v1727_v13 = vld [vmem:[%s2843_s3 + $0x8] sm:$0xff]  ;;  %v1746_v18 = vld [vmem:[%s2843_s3 + $0x10] sm:$0xff]  ;;  %v1772_v32 = vld [vmem:[%s2843_s3 + $0x38] sm:$0xff] }
   0xf   : > { %s2993_s16 = smov (!%p188_p3, %s1308_s16), 1  ;;  %s1525_s24 = smov 1   ;;  %v1713_v10 = vand.u32 127, %v294_v9  ;;  %v1767_v31 = vld [vmem:[%s2843_s3 + $0x30] sm:$0xff]  ;;  %v1777_v33 = vld [vmem:[%s2843_s3 + $0x20] sm:$0xff]  ;;  %v1782_v34 = vld [vmem:[%s2843_s3 + $0x28] sm:$0xff] }
  0x10   : > { %s1327_s17 = sshll.u32 %s2993_s16, 6  ;;  %s1526_s25 = smov 127   ;;  %v1799_v49 = vld [vmem:[%s2843_s3 + $0x50] sm:$0xff]  ;;  %v1805_v50 = vld [vmem:[%s2843_s3 + $0x58] sm:$0xff]  ;;  %v1810_v51 = vld [vmem:[%s2843_s3 + $0x40] sm:$0xff] }
  0x11   : > { %s1572_s20 = scalar_lea.vmem %s2840_s0, %s1327_s17  ;;  %s1527_s26 = smov 113   ;;  %vm296_vm0 = vcmp.lt.s32.totalorder %v1713_v10, 17  ;;  %vm321_vm1 = vcmp.lt.s32.totalorder %v1713_v10, 16  ;;  %v1815_v52 = vld [vmem:[%s2843_s3 + $0x48] sm:$0xff]  ;;  %vm346_vm2 = vcmp.lt.s32.totalorder %v1713_v10, 15  ;;  %vm371_vm3 = vcmp.lt.s32.totalorder %v1713_v10, 1 }
  0x12   : > { %v1575_v0 = vld [vmem:[%s1572_s20 + $0x8] sm:$0xff]  ;;  %v1578_v1 = vld [vmem:[%s1572_s20] sm:$0xff]  ;;  %v1585_v2 = vld [vmem:[%s1572_s20 + $0x18] sm:$0xff]  ;;  %s1528_s27 = smov 112   ;;  %s1529_s30 = smov 111   ;;  %vm396_vm4 = vcmp.lt.s32.totalorder %v1713_v10, 127 }
  0x13   : > { %286 = vrot.lane.b32.xlu1 %v1575_v0, %s1522_s21  ;;  %278 = vrot.lane.b32.xlu0 %v1578_v1, %s1522_s21  ;;  %v1588_v3 = vld [vmem:[%s1572_s20 + $0x10] sm:$0xff]  ;;  %v1598_v5 = vld [vmem:[%s1572_s20 + $0x20] sm:$0xff]  ;;  %vm421_vm5 = vcmp.lt.s32.totalorder %v1713_v10, 113  ;;  %vm446_vm6 = vcmp.lt.s32.totalorder %v1713_v10, 112  ;;  %vm471_vm7 = vcmp.lt.s32.totalorder %v1713_v10, 111  ;;  %v2991_v10 = vmov 0.0  }
  0x14   : > { %v1595_v4 = vld [vmem:[%s1572_s20 + $0x30] sm:$0xff]  ;;  %v1605_v6 = vld [vmem:[%s1572_s20 + $0x38] sm:$0xff]  ;;  %v1608_v7 = vld [vmem:[%s1572_s20 + $0x28] sm:$0xff] }
  0x17   : > { %288 = vrot.lane.b32.xlu1 %v1585_v2, %s1522_s21  ;;  %280 = vrot.lane.b32.xlu0 %v1588_v3, %s1522_s21 }
  0x1b   : > { %284 = vrot.lane.b32.xlu1 %v1595_v4, %s1522_s21  ;;  %282 = vrot.lane.b32.xlu0 %v1598_v5, %s1522_s21 }
  0x1f   : > { %292 = vrot.lane.b32.xlu1 %v1605_v6, %s1522_s21  ;;  %290 = vrot.lane.b32.xlu0 %v1608_v7, %s1522_s21 }
  0x23   : > { %307 = vrot.lane.b32.xlu1 %v1588_v3, %s1523_s22  ;;  %305 = vrot.lane.b32.xlu0 %v1578_v1, %s1523_s22 }
  0x27   : > { %315 = vrot.lane.b32.xlu1 %v1585_v2, %s1523_s22  ;;  %313 = vrot.lane.b32.xlu0 %v1575_v0, %s1523_s22 }
  0x2b   : > { %311 = vrot.lane.b32.xlu1 %v1595_v4, %s1523_s22  ;;  %309 = vrot.lane.b32.xlu0 %v1598_v5, %s1523_s22 }
  0x2f   : > { %319 = vrot.lane.b32.xlu1 %v1605_v6, %s1523_s22  ;;  %317 = vrot.lane.b32.xlu0 %v1608_v7, %s1523_s22 }
  0x33   : > { %332 = vrot.lane.b32.xlu1 %v1588_v3, %s1524_s23  ;;  %330 = vrot.lane.b32.xlu0 %v1578_v1, %s1524_s23 }
  0x37   : > { %340 = vrot.lane.b32.xlu1 %v1585_v2, %s1524_s23  ;;  %338 = vrot.lane.b32.xlu0 %v1575_v0, %s1524_s23 }
  0x3b   : > { %336 = vrot.lane.b32.xlu1 %v1595_v4, %s1524_s23  ;;  %334 = vrot.lane.b32.xlu0 %v1598_v5, %s1524_s23 }
  0x3f   : > { %344 = vrot.lane.b32.xlu1 %v1605_v6, %s1524_s23  ;;  %342 = vrot.lane.b32.xlu0 %v1608_v7, %s1524_s23 }
  0x43   : > { %357 = vrot.lane.b32.xlu1 %v1588_v3, %s1525_s24  ;;  %355 = vrot.lane.b32.xlu0 %v1578_v1, %s1525_s24 }
  0x47   : > { %365 = vrot.lane.b32.xlu1 %v1585_v2, %s1525_s24  ;;  %363 = vrot.lane.b32.xlu0 %v1575_v0, %s1525_s24 }
  0x4b   : > { %361 = vrot.lane.b32.xlu1 %v1595_v4, %s1525_s24  ;;  %359 = vrot.lane.b32.xlu0 %v1598_v5, %s1525_s24 }
  0x4f   : > { %369 = vrot.lane.b32.xlu1 %v1605_v6, %s1525_s24  ;;  %367 = vrot.lane.b32.xlu0 %v1608_v7, %s1525_s24 }
  0x53   : > { %382 = vrot.lane.b32.xlu1 %v1588_v3, %s1526_s25  ;;  %380 = vrot.lane.b32.xlu0 %v1578_v1, %s1526_s25 }
  0x57   : > { %390 = vrot.lane.b32.xlu1 %v1585_v2, %s1526_s25  ;;  %388 = vrot.lane.b32.xlu0 %v1575_v0, %s1526_s25 }
  0x5b   : > { %386 = vrot.lane.b32.xlu1 %v1595_v4, %s1526_s25  ;;  %384 = vrot.lane.b32.xlu0 %v1598_v5, %s1526_s25 }
  0x5f   : > { %394 = vrot.lane.b32.xlu1 %v1605_v6, %s1526_s25  ;;  %392 = vrot.lane.b32.xlu0 %v1608_v7, %s1526_s25 }
  0x63   : > { %407 = vrot.lane.b32.xlu1 %v1588_v3, %s1527_s26  ;;  %405 = vrot.lane.b32.xlu0 %v1578_v1, %s1527_s26 }
  0x67   : > { %415 = vrot.lane.b32.xlu1 %v1585_v2, %s1527_s26  ;;  %413 = vrot.lane.b32.xlu0 %v1575_v0, %s1527_s26 }
  0x6b   : > { %411 = vrot.lane.b32.xlu1 %v1595_v4, %s1527_s26  ;;  %409 = vrot.lane.b32.xlu0 %v1598_v5, %s1527_s26 }
  0x6f   : > { %419 = vrot.lane.b32.xlu1 %v1605_v6, %s1527_s26  ;;  %417 = vrot.lane.b32.xlu0 %v1608_v7, %s1527_s26 }
  0x73   : > { %432 = vrot.lane.b32.xlu1 %v1588_v3, %s1528_s27  ;;  %430 = vrot.lane.b32.xlu0 %v1578_v1, %s1528_s27 }
  0x77   : > { %440 = vrot.lane.b32.xlu1 %v1585_v2, %s1528_s27  ;;  %438 = vrot.lane.b32.xlu0 %v1575_v0, %s1528_s27 }
  0x7b   : > { %436 = vrot.lane.b32.xlu1 %v1595_v4, %s1528_s27  ;;  %434 = vrot.lane.b32.xlu0 %v1598_v5, %s1528_s27 }
  0x7f   : > { %444 = vrot.lane.b32.xlu1 %v1605_v6, %s1528_s27  ;;  %442 = vrot.lane.b32.xlu0 %v1608_v7, %s1528_s27 }
  0x83   : > { %457 = vrot.lane.b32.xlu1 %v1588_v3, %s1529_s30  ;;  %455 = vrot.lane.b32.xlu0 %v1578_v1, %s1529_s30 }
  0x85   : > { %v287_v11 = vpop.permute.xlu1 %286  ;;  %v279_v12 = vpop.permute.xlu0 %278 }
  0x86   : > { %v297_v14 = vsel %vm296_vm0, %v279_v12, %v287_v11  ;;  %v301_v15 = vsel %vm296_vm0, %v287_v11, %v279_v12  ;;  %v1832_v12 = vld [vmem:[%s2843_s3 + $0x70] sm:$0xff] }
  0x87   : > { %465 = vrot.lane.b32.xlu1 %v1585_v2, %s1529_s30  ;;  %463 = vrot.lane.b32.xlu0 %v1575_v0, %s1529_s30  ;;  %v481_v23 = vmul.f32 %v297_v14, %v1727_v13  ;;  %v480_v25 = vmul.f32 %v301_v15, %v1741_v17  ;;  %v1837_v14 = vld [vmem:[%s2843_s3 + $0x78] sm:$0xff]  ;;  %v1842_v15 = vld [vmem:[%s2843_s3 + $0x60] sm:$0xff] }
  0x89   : > { %v289_v19 = vpop.permute.xlu1 %288  ;;  %v281_v20 = vpop.permute.xlu0 %280 }
  0x8a   : > { %v302_v21 = vsel %vm296_vm0, %v289_v19, %v281_v20  ;;  %v298_v22 = vsel %vm296_vm0, %v281_v20, %v289_v19  ;;  %v1847_v19 = vld [vmem:[%s2843_s3 + $0x68] sm:$0xff] }
  0x8b   : > { %461 = vrot.lane.b32.xlu1 %v1595_v4, %s1529_s30  ;;  %459 = vrot.lane.b32.xlu0 %v1598_v5, %s1529_s30  ;;  %v483_v24 = vmul.f32 %v298_v22, %v1736_v16  ;;  %v482_v26 = vmul.f32 %v302_v21, %v1746_v18 }
  0x8d   : > { %v285_v27 = vpop.permute.xlu1 %284  ;;  %v283_v28 = vpop.permute.xlu0 %282  ;;  %v1329_v29 = vpack.c.bf16 %v483_v24, %v481_v23  ;;  %v1331_v30 = vpack.c.bf16 %v482_v26, %v480_v25 }
  0x8f   : > { %469 = vrot.lane.b32.xlu1 %v1605_v6, %s1529_s30  ;;  %467 = vrot.lane.b32.xlu0 %v1608_v7, %s1529_s30 }
  0x90   : > { %1330 = vmatprep.subr.bf16.mxu0 %v1329_v29 }
  0x91   : > { %1332 = vmatpush1.bf16.msra.mxu0 %v1331_v30  ;;  %v293_v35 = vpop.permute.xlu1 %292  ;;  %v291_v36 = vpop.permute.xlu0 %290 }
  0x92   : > { %v300_v37 = vsel %vm296_vm0, %v285_v27, %v293_v35  ;;  %v304_v38 = vsel %vm296_vm0, %v293_v35, %v285_v27  ;;  %v299_v39 = vsel %vm296_vm0, %v283_v28, %v291_v36  ;;  %v303_v40 = vsel %vm296_vm0, %v291_v36, %v283_v28 }
  0x93   : > { %v486_v41 = vmul.f32 %v304_v38, %v1767_v31  ;;  %v487_v42 = vmul.f32 %v300_v37, %v1772_v32  ;;  %v484_v43 = vmul.f32 %v303_v40, %v1777_v33  ;;  %v485_v44 = vmul.f32 %v299_v39, %v1782_v34  ;;  %v1864_v38 = vld [vmem:[%s2843_s3 + $0x90] sm:$0xff]  ;;  %v1870_v39 = vld [vmem:[%s2843_s3 + $0x98] sm:$0xff]  ;;  %v1875_v40 = vld [vmem:[%s2843_s3 + $0x80] sm:$0xff] }
  0x95   : > { %v308_v45 = vpop.permute.xlu1 %307  ;;  %v306_v46 = vpop.permute.xlu0 %305  ;;  %v1333_v47 = vpack.c.bf16 %v487_v42, %v485_v44  ;;  %v1335_v48 = vpack.c.bf16 %v486_v41, %v484_v43  ;;  %v1880_v41 = vld [vmem:[%s2843_s3 + $0x88] sm:$0xff] }
  0x97   : > { %1334 = vmatprep.subr.bf16.mxu0 %v1333_v47 }
  0x98   : > { %1336 = vmatpush1.bf16.msra.mxu0 %v1335_v48 }
  0x99   : > { %v316_v53 = vpop.permute.xlu1 %315  ;;  %v314_v54 = vpop.permute.xlu0 %313 }
  0x9a   : > { %v323_v55 = vsel %vm321_vm1, %v308_v45, %v316_v53  ;;  %v327_v56 = vsel %vm321_vm1, %v316_v53, %v308_v45  ;;  %v322_v57 = vsel %vm321_vm1, %v306_v46, %v314_v54  ;;  %v326_v58 = vsel %vm321_vm1, %v314_v54, %v306_v46 }
  0x9b   : > { %v490_v59 = vmul.f32 %v327_v56, %v1799_v49  ;;  %v491_v60 = vmul.f32 %v323_v55, %v1805_v50  ;;  %v488_v61 = vmul.f32 %v326_v58, %v1810_v51  ;;  %v489_v62 = vmul.f32 %v322_v57, %v1815_v52 }
  0x9d   : > { %v312_v63 = vpop.permute.xlu1 %311  ;;  %v310_v8 = vpop.permute.xlu0 %309  ;;  %v1337_v9 = vpack.c.bf16 %v491_v60, %v489_v62  ;;  %v1339_v11 = vpack.c.bf16 %v490_v59, %v488_v61  ;;  %v1897_v60 = vld [vmem:[%s2843_s3 + $0xb0] sm:$0xff]  ;;  %v1902_v61 = vld [vmem:[%s2843_s3 + $0xb8] sm:$0xff]  ;;  %v1907_v62 = vld [vmem:[%s2843_s3 + $0xa0] sm:$0xff] }
  0x9f   : > { %1338 = vmatprep.subr.bf16.mxu0 %v1337_v9 }
  0xa0   : > { %1340 = vmatpush1.bf16.msra.mxu0 %v1339_v11 }
  0xa1   : > { %v320_v20 = vpop.permute.xlu1 %319  ;;  %v318_v21 = vpop.permute.xlu0 %317 }
  0xa2   : > { %v325_v22 = vsel %vm321_vm1, %v312_v63, %v320_v20  ;;  %v329_v23 = vsel %vm321_vm1, %v320_v20, %v312_v63  ;;  %v324_v24 = vsel %vm321_vm1, %v310_v8, %v318_v21  ;;  %v328_v25 = vsel %vm321_vm1, %v318_v21, %v310_v8  ;;  %v1912_v63 = vld [vmem:[%s2843_s3 + $0xa8] sm:$0xff] }
  0xa3   : > { %v494_v26 = vmul.f32 %v329_v23, %v1832_v12  ;;  %v495_v27 = vmul.f32 %v325_v22, %v1837_v14  ;;  %v492_v28 = vmul.f32 %v328_v25, %v1842_v15  ;;  %v493_v29 = vmul.f32 %v324_v24, %v1847_v19 }
  0xa5   : > { %v333_v30 = vpop.permute.xlu1 %332  ;;  %v331_v35 = vpop.permute.xlu0 %330  ;;  %v1341_v36 = vpack.c.bf16 %v495_v27, %v493_v29  ;;  %v1343_v37 = vpack.c.bf16 %v494_v26, %v492_v28 }
  0xa7   : > { %1342 = vmatprep.subr.bf16.mxu0 %v1341_v36  ;;  %v1935_v36 = vld [vmem:[%s2843_s3 + $0xd8] sm:$0xff] }
  0xa8   : > { %1344 = vmatpush1.bf16.msra.mxu0 %v1343_v37  ;;  %v1940_v37 = vld [vmem:[%s2843_s3 + $0xc0] sm:$0xff] }
  0xa9   : > { %v341_v42 = vpop.permute.xlu1 %340  ;;  %v339_v43 = vpop.permute.xlu0 %338 }
  0xaa   : > { %v348_v44 = vsel %vm346_vm2, %v333_v30, %v341_v42  ;;  %v352_v45 = vsel %vm346_vm2, %v341_v42, %v333_v30  ;;  %v347_v46 = vsel %vm346_vm2, %v331_v35, %v339_v43  ;;  %v351_v47 = vsel %vm346_vm2, %v339_v43, %v331_v35  ;;  %v1929_v35 = vld [vmem:[%s2843_s3 + $0xd0] sm:$0xff]  ;;  %v1945_v42 = vld [vmem:[%s2843_s3 + $0xc8] sm:$0xff] }
  0xab   : > { %v498_v48 = vmul.f32 %v352_v45, %v1864_v38  ;;  %v499_v53 = vmul.f32 %v348_v44, %v1870_v39  ;;  %v496_v54 = vmul.f32 %v351_v47, %v1875_v40  ;;  %v497_v55 = vmul.f32 %v347_v46, %v1880_v41 }
  0xad   : > { %v337_v56 = vpop.permute.xlu1 %336  ;;  %v335_v57 = vpop.permute.xlu0 %334  ;;  %v1345_v58 = vpack.c.bf16 %v499_v53, %v497_v55  ;;  %v1347_v59 = vpack.c.bf16 %v498_v48, %v496_v54 }
  0xaf   : > { %1346 = vmatprep.subr.bf16.mxu0 %v1345_v58 }
  0xb0   : > { %1348 = vmatpush1.bf16.msra.mxu0 %v1347_v59 }
  0xb1   : > { %v345_v8 = vpop.permute.xlu1 %344  ;;  %v343_v9 = vpop.permute.xlu0 %342 }
  0xb2   : > { %v350_v11 = vsel %vm346_vm2, %v337_v56, %v345_v8  ;;  %v354_v20 = vsel %vm346_vm2, %v345_v8, %v337_v56  ;;  %v349_v21 = vsel %vm346_vm2, %v335_v57, %v343_v9  ;;  %v353_v22 = vsel %vm346_vm2, %v343_v9, %v335_v57  ;;  %v1962_v9 = vld [vmem:[%s2843_s3 + $0x108] sm:$0xff] }
  0xb3   : > { %v502_v23 = vmul.f32 %v354_v20, %v1897_v60  ;;  %v503_v24 = vmul.f32 %v350_v11, %v1902_v61  ;;  %v500_v25 = vmul.f32 %v353_v22, %v1907_v62  ;;  %v501_v26 = vmul.f32 %v349_v21, %v1912_v63  ;;  %2895 = vst [vmem:[#allocation2_spill] sm:$0xff] %v1962_v9  ;;  %v1967_v11 = vld [vmem:[%s2843_s3 + $0x118] sm:$0xff]  ;;  %v1972_v20 = vld [vmem:[%s2843_s3 + $0xf0] sm:$0xff]  ;;  %v1982_v22 = vld [vmem:[%s2843_s3 + $0xe0] sm:$0xff] }
  0xb4   : > { %2896 = vst [vmem:[#allocation3_spill] sm:$0xff] %v1967_v11  ;;  %2897 = vst [vmem:[#allocation4_spill] sm:$0xff] %v1972_v20  ;;  %v1977_v21 = vld [vmem:[%s2843_s3 + $0xf8] sm:$0xff] }
  0xb5   : > { %v358_v27 = vpop.permute.xlu1 %357  ;;  %v356_v28 = vpop.permute.xlu0 %355  ;;  %v1349_v29 = vpack.c.bf16 %v503_v24, %v501_v26  ;;  %v1351_v30 = vpack.c.bf16 %v502_v23, %v500_v25  ;;  %2898 = vst [vmem:[#allocation5_spill] sm:$0xff] %v1977_v21  ;;  %2899 = vst [vmem:[#allocation6_spill] sm:$0xff] %v1982_v22  ;;  %v1987_v23 = vld [vmem:[%s2843_s3 + $0xe8] sm:$0xff]  ;;  %v513_v24 = vmul.f32 %v1575_v0, %v1962_v9 }
  0xb6   : > { %2900 = vst [vmem:[#allocation7_spill] sm:$0xff] %v1987_v23  ;;  %v515_v25 = vmul.f32 %v1585_v2, %v1967_v11 }
  0xb7   : > { %1350 = vmatprep.subr.bf16.mxu0 %v1349_v29  ;;  %v2001_v29 = vld [vmem:[%s2843_s3 + $0x110] sm:$0xff] }
  0xb8   : > { %1352 = vmatpush1.bf16.msra.mxu0 %v1351_v30  ;;  %2902 = vst [vmem:[#allocation9_spill] sm:$0xff] %v2001_v29 }
  0xb9   : > { %v366_v43 = vpop.permute.xlu1 %365  ;;  %v364_v44 = vpop.permute.xlu0 %363 }
  0xba   : > { %v373_v45 = vsel %vm371_vm3, %v358_v27, %v366_v43  ;;  %v377_v46 = vsel %vm371_vm3, %v366_v43, %v358_v27  ;;  %v372_v47 = vsel %vm371_vm3, %v356_v28, %v364_v44  ;;  %v376_v48 = vsel %vm371_vm3, %v364_v44, %v356_v28  ;;  %v1996_v28 = vld [vmem:[%s2843_s3 + $0x100] sm:$0xff]  ;;  %v2014_v44 = vld [vmem:[%s2843_s3 + $0x128] sm:$0xff] }
  0xbb   : > { %v506_v53 = vmul.f32 %v377_v46, %v1929_v35  ;;  %v507_v54 = vmul.f32 %v373_v45, %v1935_v36  ;;  %v504_v55 = vmul.f32 %v376_v48, %v1940_v37  ;;  %v505_v56 = vmul.f32 %v372_v47, %v1945_v42  ;;  %2901 = vst [vmem:[#allocation8_spill] sm:$0xff] %v1996_v28  ;;  %v2019_v45 = vld [vmem:[%s2843_s3 + $0x138] sm:$0xff] }
  0xbc   : > { %2903 = vst [vmem:[#allocation10_spill] sm:$0xff] %v2014_v44  ;;  %2904 = vst [vmem:[#allocation11_spill] sm:$0xff] %v2019_v45 }
  0xbd   : > { %v362_v57 = vpop.permute.xlu1 %361  ;;  %v360_v58 = vpop.permute.xlu0 %359  ;;  %v1353_v59 = vpack.c.bf16 %v507_v54, %v505_v56  ;;  %v1355_v8 = vpack.c.bf16 %v506_v53, %v504_v55  ;;  %v1361_v54 = vpack.c.bf16 %v515_v25, %v513_v24  ;;  %v512_v55 = vmul.f32 %v1578_v1, %v1996_v28  ;;  %v2036_v24 = vld [vmem:[%s2843_s3 + $0x120] sm:$0xff]  ;;  %v2041_v1 = vld [vmem:[%s2843_s3 + $0x130] sm:$0xff] }
  0xbe   : > { %v514_v56 = vmul.f32 %v1588_v3, %v2001_v29  ;;  %2905 = vst [vmem:[#allocation12_spill] sm:$0xff] %v2036_v24  ;;  %2906 = vst [vmem:[#allocation13_spill] sm:$0xff] %v2041_v1  ;;  %v2047_v3 = vld [vmem:[%s2843_s3 + $0x158] sm:$0xff]  ;;  %v516_v25 = vmul.f32 %v1598_v5, %v2036_v24  ;;  %v2070_v5 = vld [vmem:[%s2843_s3 + $0x140] sm:$0xff] }
  0xbf   : > { %1354 = vmatprep.subr.bf16.mxu0 %v1353_v59 }
  0xc0   : > { %1356 = vmatpush1.bf16.msra.mxu0 %v1355_v8 }
  0xc1   : > { %v370_v26 = vpop.permute.xlu1 %369  ;;  %v368_v27 = vpop.permute.xlu0 %367 }
  0xc2   : > { %v375_v30 = vsel %vm371_vm3, %v362_v57, %v370_v26  ;;  %v379_v0 = vsel %vm371_vm3, %v370_v26, %v362_v57  ;;  %v374_v2 = vsel %vm371_vm3, %v360_v58, %v368_v27  ;;  %v378_v43 = vsel %vm371_vm3, %v368_v27, %v360_v58 }
  0xc3   : > { %v510_v46 = vmul.f32 %v379_v0, %v1972_v20  ;;  %v511_v47 = vmul.f32 %v375_v30, %v1977_v21  ;;  %v508_v48 = vmul.f32 %v378_v43, %v1982_v22  ;;  %v509_v53 = vmul.f32 %v374_v2, %v1987_v23 }
  0xc4   : > { %v517_v26 = vmul.f32 %v1608_v7, %v2014_v44  ;;  %v519_v27 = vmul.f32 %v1605_v6, %v2019_v45  ;;  %v2052_v6 = vld [vmem:[%s2843_s3 + $0x148] sm:$0xff]  ;;  %v1363_v7 = vpack.c.bf16 %v514_v56, %v512_v55  ;;  %v518_v30 = vmul.f32 %v1595_v4, %v2041_v1 }
  0xc5   : > { %v383_v57 = vpop.permute.xlu1 %382  ;;  %v381_v58 = vpop.permute.xlu0 %380  ;;  %v1357_v59 = vpack.c.bf16 %v511_v47, %v509_v53  ;;  %v1359_v8 = vpack.c.bf16 %v510_v46, %v508_v48  ;;  %v2061_v46 = vld [vmem:[%s2843_s3 + $0x150] sm:$0xff] }
  0xc6   : > { %v1365_v43 = vpack.c.bf16 %v519_v27, %v517_v26  ;;  %v1367_v56 = vpack.c.bf16 %v518_v30, %v516_v25  ;;  %v2083_v27 = vld [vmem:[%s2843_s3 + $0x170] sm:$0xff]  ;;  %v2098_v25 = vld [vmem:[%s2843_s3 + $0x168] sm:$0xff] }
  0xc7   : > { %1358 = vmatprep.subr.bf16.mxu0 %v1357_v59  ;;  %2907 = vst [vmem:[#allocation14_spill] sm:$0xff] %v2083_v27  ;;  %2910 = vst [vmem:[#allocation17_spill] sm:$0xff] %v2098_v25 }
  0xc8   : > { %1360 = vmatpush1.bf16.msra.mxu0 %v1359_v8 }
  0xc9   : > { %v391_v0 = vpop.permute.xlu1 %390  ;;  %v389_v2 = vpop.permute.xlu0 %388  ;;  %1362 = vmatprep.subr.bf16.mxu0 %v1361_v54 }
  0xca   : > { %v398_v47 = vsel %vm396_vm4, %v383_v57, %v391_v0  ;;  %v402_v48 = vsel %vm396_vm4, %v391_v0, %v383_v57  ;;  %v397_v4 = vsel %vm396_vm4, %v381_v58, %v389_v2  ;;  %v401_v53 = vsel %vm396_vm4, %v389_v2, %v381_v58  ;;  %v2088_v58 = vld [vmem:[%s2843_s3 + $0x178] sm:$0xff] }
  0xcb   : > { %v523_v54 = vmul.f32 %v402_v48, %v2047_v3  ;;  %v521_v55 = vmul.f32 %v401_v53, %v2052_v6  ;;  %v522_v59 = vmul.f32 %v398_v47, %v2061_v46  ;;  %v520_v57 = vmul.f32 %v397_v4, %v2070_v5  ;;  %2908 = vst [vmem:[#allocation15_spill] sm:$0xff] %v2088_v58 }
  0xcc   : > { %1364 = vmatpush1.bf16.msra.mxu0 %v1363_v7  ;;  %v2093_v7 = vld [vmem:[%s2843_s3 + $0x160] sm:$0xff] }
  0xcd   : > { %v387_v8 = vpop.permute.xlu1 %386  ;;  %v385_v26 = vpop.permute.xlu0 %384  ;;  %1366 = vmatprep.subr.bf16.mxu0 %v1365_v43  ;;  %v1369_v0 = vpack.c.bf16 %v523_v54, %v521_v55  ;;  %2909 = vst [vmem:[#allocation16_spill] sm:$0xff] %v2093_v7  ;;  %v1371_v43 = vpack.c.bf16 %v522_v59, %v520_v57 }
  0xd0   : > { %1368 = vmatpush1.bf16.msra.mxu0 %v1367_v56 }
  0xd1   : > { %v395_v30 = vpop.permute.xlu1 %394  ;;  %v393_v2 = vpop.permute.xlu0 %392  ;;  %1370 = vmatprep.subr.bf16.mxu0 %v1369_v0 }
  0xd2   : > { %v400_v47 = vsel %vm396_vm4, %v387_v8, %v395_v30  ;;  %v404_v48 = vsel %vm396_vm4, %v395_v30, %v387_v8  ;;  %v399_v4 = vsel %vm396_vm4, %v385_v26, %v393_v2  ;;  %v403_v53 = vsel %vm396_vm4, %v393_v2, %v385_v26  ;;  %v2115_v8 = vld [vmem:[%s2843_s3 + $0x190] sm:$0xff]  ;;  %v2121_v26 = vld [vmem:[%s2843_s3 + $0x198] sm:$0xff]  ;;  %v2126_v30 = vld [vmem:[%s2843_s3 + $0x180] sm:$0xff] }
  0xd3   : > { %v526_v54 = vmul.f32 %v400_v47, %v2083_v27  ;;  %v527_v55 = vmul.f32 %v404_v48, %v2088_v58  ;;  %v524_v56 = vmul.f32 %v399_v4, %v2093_v7  ;;  %v525_v59 = vmul.f32 %v403_v53, %v2098_v25  ;;  %2911 = vst [vmem:[#allocation18_spill] sm:$0xff] %v2115_v8 }
  0xd4   : > { %1372 = vmatpush1.bf16.msra.mxu0 %v1371_v43  ;;  %2912 = vst [vmem:[#allocation19_spill] sm:$0xff] %v2121_v26  ;;  %2913 = vst [vmem:[#allocation20_spill] sm:$0xff] %v2126_v30 }
  0xd5   : > { %v408_v57 = vpop.permute.xlu1 %407  ;;  %v406_v0 = vpop.permute.xlu0 %405  ;;  %v1373_v24 = vpack.c.bf16 %v527_v55, %v525_v59  ;;  %v1375_v1 = vpack.c.bf16 %v526_v54, %v524_v56 }
  0xd7   : > { %1374 = vmatprep.subr.bf16.mxu0 %v1373_v24  ;;  %v2131_v24 = vld [vmem:[%s2843_s3 + $0x188] sm:$0xff] }
  0xd8   : > { %1376 = vmatpush1.bf16.msra.mxu0 %v1375_v1  ;;  %2914 = vst [vmem:[#allocation21_spill] sm:$0xff] %v2131_v24 }
  0xd9   : > { %v416_v2 = vpop.permute.xlu1 %415  ;;  %v414_v43 = vpop.permute.xlu0 %413 }
  0xda   : > { %v423_v1 = vsel %vm421_vm5, %v408_v57, %v416_v2  ;;  %v427_v47 = vsel %vm421_vm5, %v416_v2, %v408_v57  ;;  %v422_v48 = vsel %vm421_vm5, %v406_v0, %v414_v43  ;;  %v426_v4 = vsel %vm421_vm5, %v414_v43, %v406_v0  ;;  %v2148_v57 = vld [vmem:[%s2843_s3 + $0x1b0] sm:$0xff]  ;;  %v2153_v0 = vld [vmem:[%s2843_s3 + $0x1b8] sm:$0xff]  ;;  %v2158_v2 = vld [vmem:[%s2843_s3 + $0x1a0] sm:$0xff] }
  0xdb   : > { %v530_v53 = vmul.f32 %v423_v1, %v2115_v8  ;;  %v531_v54 = vmul.f32 %v427_v47, %v2121_v26  ;;  %v528_v55 = vmul.f32 %v422_v48, %v2126_v30  ;;  %v529_v56 = vmul.f32 %v426_v4, %v2131_v24  ;;  %2915 = vst [vmem:[#allocation22_spill] sm:$0xff] %v2148_v57 }
  0xdc   : > { %2916 = vst [vmem:[#allocation23_spill] sm:$0xff] %v2153_v0  ;;  %2917 = vst [vmem:[#allocation24_spill] sm:$0xff] %v2158_v2 }
  0xdd   : > { %v412_v59 = vpop.permute.xlu1 %411  ;;  %v410_v58 = vpop.permute.xlu0 %409  ;;  %v1377_v27 = vpack.c.bf16 %v531_v54, %v529_v56  ;;  %v1379_v25 = vpack.c.bf16 %v530_v53, %v528_v55 }
  0xdf   : > { %1378 = vmatprep.subr.bf16.mxu0 %v1377_v27  ;;  %v2163_v27 = vld [vmem:[%s2843_s3 + $0x1a8] sm:$0xff] }
  0xe0   : > { %1380 = vmatpush1.bf16.msra.mxu0 %v1379_v25  ;;  %2918 = vst [vmem:[#allocation25_spill] sm:$0xff] %v2163_v27 }
  0xe1   : > { %v420_v43 = vpop.permute.xlu1 %419  ;;  %v418_v1 = vpop.permute.xlu0 %417 }
  0xe2   : > { %v425_v25 = vsel %vm421_vm5, %v412_v59, %v420_v43  ;;  %v429_v47 = vsel %vm421_vm5, %v420_v43, %v412_v59  ;;  %v424_v48 = vsel %vm421_vm5, %v410_v58, %v418_v1  ;;  %v428_v4 = vsel %vm421_vm5, %v418_v1, %v410_v58  ;;  %v2180_v59 = vld [vmem:[%s2843_s3 + $0x1d0] sm:$0xff]  ;;  %v2186_v58 = vld [vmem:[%s2843_s3 + $0x1d8] sm:$0xff]  ;;  %v2191_v43 = vld [vmem:[%s2843_s3 + $0x1c0] sm:$0xff] }
  0xe3   : > { %v534_v53 = vmul.f32 %v425_v25, %v2148_v57  ;;  %v535_v54 = vmul.f32 %v429_v47, %v2153_v0  ;;  %v532_v55 = vmul.f32 %v424_v48, %v2158_v2  ;;  %v533_v56 = vmul.f32 %v428_v4, %v2163_v27  ;;  %2919 = vst [vmem:[#allocation26_spill] sm:$0xff] %v2180_v59 }
  0xe4   : > { %2920 = vst [vmem:[#allocation27_spill] sm:$0xff] %v2186_v58  ;;  %2921 = vst [vmem:[#allocation28_spill] sm:$0xff] %v2191_v43 }
  0xe5   : > { %v433_v8 = vpop.permute.xlu1 %432  ;;  %v431_v30 = vpop.permute.xlu0 %430  ;;  %v1381_v26 = vpack.c.bf16 %v535_v54, %v533_v56  ;;  %v1383_v24 = vpack.c.bf16 %v534_v53, %v532_v55 }
  0xe7   : > { %1382 = vmatprep.subr.bf16.mxu0 %v1381_v26  ;;  %v2196_v26 = vld [vmem:[%s2843_s3 + $0x1c8] sm:$0xff] }
  0xe8   : > { %1384 = vmatpush1.bf16.msra.mxu0 %v1383_v24  ;;  %2922 = vst [vmem:[#allocation29_spill] sm:$0xff] %v2196_v26 }
  0xe9   : > { %v441_v1 = vpop.permute.xlu1 %440  ;;  %v439_v25 = vpop.permute.xlu0 %438 }
  0xea   : > { %v448_v24 = vsel %vm446_vm6, %v433_v8, %v441_v1  ;;  %v452_v47 = vsel %vm446_vm6, %v441_v1, %v433_v8  ;;  %v447_v48 = vsel %vm446_vm6, %v431_v30, %v439_v25  ;;  %v451_v4 = vsel %vm446_vm6, %v439_v25, %v431_v30  ;;  %v2213_v8 = vld [vmem:[%s2843_s3 + $0x1f0] sm:$0xff]  ;;  %v2218_v30 = vld [vmem:[%s2843_s3 + $0x1f8] sm:$0xff]  ;;  %v2223_v1 = vld [vmem:[%s2843_s3 + $0x1e0] sm:$0xff] }
  0xeb   : > { %v538_v53 = vmul.f32 %v448_v24, %v2180_v59  ;;  %v539_v54 = vmul.f32 %v452_v47, %v2186_v58  ;;  %v536_v55 = vmul.f32 %v447_v48, %v2191_v43  ;;  %v537_v56 = vmul.f32 %v451_v4, %v2196_v26  ;;  %2923 = vst [vmem:[#allocation30_spill] sm:$0xff] %v2213_v8 }
  0xec   : > { %2924 = vst [vmem:[#allocation31_spill] sm:$0xff] %v2218_v30  ;;  %2925 = vst [vmem:[#allocation32_spill] sm:$0xff] %v2223_v1 }
  0xed   : > { %v437_v0 = vpop.permute.xlu1 %436  ;;  %v435_v57 = vpop.permute.xlu0 %434  ;;  %v1385_v27 = vpack.c.bf16 %v539_v54, %v537_v56  ;;  %v1387_v2 = vpack.c.bf16 %v538_v53, %v536_v55 }
  0xef   : > { %1386 = vmatprep.subr.bf16.mxu0 %v1385_v27  ;;  %v2228_v27 = vld [vmem:[%s2843_s3 + $0x1e8] sm:$0xff] }
  0xf0   : > { %1388 = vmatpush1.bf16.msra.mxu0 %v1387_v2  ;;  %2926 = vst [vmem:[#allocation33_spill] sm:$0xff] %v2228_v27 }
  0xf1   : > { %v445_v25 = vpop.permute.xlu1 %444  ;;  %v443_v24 = vpop.permute.xlu0 %442 }
  0xf2   : > { %v450_v2 = vsel %vm446_vm6, %v437_v0, %v445_v25  ;;  %v454_v47 = vsel %vm446_vm6, %v445_v25, %v437_v0  ;;  %v449_v48 = vsel %vm446_vm6, %v435_v57, %v443_v24  ;;  %v453_v4 = vsel %vm446_vm6, %v443_v24, %v435_v57  ;;  %v2245_v0 = vld [vmem:[%s2843_s3 + $0x210] sm:$0xff]  ;;  %v2250_v57 = vld [vmem:[%s2843_s3 + $0x218] sm:$0xff]  ;;  %v2256_v25 = vld [vmem:[%s2843_s3 + $0x200] sm:$0xff] }
  0xf3   : > { %v542_v53 = vmul.f32 %v450_v2, %v2213_v8  ;;  %v543_v54 = vmul.f32 %v454_v47, %v2218_v30  ;;  %v540_v55 = vmul.f32 %v449_v48, %v2223_v1  ;;  %v541_v56 = vmul.f32 %v453_v4, %v2228_v27  ;;  %2927 = vst [vmem:[#allocation34_spill] sm:$0xff] %v2245_v0  ;;  %v552_v24 = vld [vmem:[%s2841_s1] sm:$0xff] }
  0xf4   : > { %2928 = vst [vmem:[#allocation35_spill] sm:$0xff] %v2250_v57  ;;  %2929 = vst [vmem:[#allocation36_spill] sm:$0xff] %v2256_v25 }
  0xf5   : > { %v458_v59 = vpop.permute.xlu1 %457  ;;  %v456_v43 = vpop.permute.xlu0 %455  ;;  %v1389_v58 = vpack.c.bf16 %v543_v54, %v541_v56  ;;  %v1391_v26 = vpack.c.bf16 %v542_v53, %v540_v55 }
  0xf7   : > { %1390 = vmatprep.subr.bf16.mxu0 %v1389_v58  ;;  %v2261_v58 = vld [vmem:[%s2843_s3 + $0x208] sm:$0xff] }
  0xf8   : > { %1392 = vmatpush1.bf16.msra.mxu0 %v1391_v26  ;;  %2930 = vst [vmem:[#allocation37_spill] sm:$0xff] %v2261_v58  ;;  %v556_v26 = vld [vmem:[%s2841_s1 + $0x20] sm:$0xff] }
  0xf9   : > { %v466_v2 = vpop.permute.xlu1 %465  ;;  %v464_v47 = vpop.permute.xlu0 %463 }
  0xfa   : > { %v473_v48 = vsel %vm471_vm7, %v458_v59, %v466_v2  ;;  %v477_v4 = vsel %vm471_vm7, %v466_v2, %v458_v59  ;;  %v472_v53 = vsel %vm471_vm7, %v456_v43, %v464_v47  ;;  %v476_v54 = vsel %vm471_vm7, %v464_v47, %v456_v43  ;;  %v555_v59 = vld [vmem:[%s2841_s1 + $0x18] sm:$0xff]  ;;  %v2290_v47 = vld [vmem:[%s2843_s3 + $0x230] sm:$0xff] }
  0xfb   : > { %v546_v55 = vmul.f32 %v473_v48, %v2245_v0  ;;  %v547_v56 = vmul.f32 %v477_v4, %v2250_v57  ;;  %v544_v30 = vmul.f32 %v472_v53, %v2256_v25  ;;  %v545_v8 = vmul.f32 %v476_v54, %v2261_v58  ;;  %642 = vmatmul.mubr.f32.vlgmr.msra.gmra.mrb[0].mxu0 %v552_v24  ;;  %v559_v43 = vld [vmem:[%s2841_s1 + $0x38] sm:$0xff]  ;;  %v562_v4 = vld [vmem:[%s2841_s1 + $0x50] sm:$0xff] }
  0xfc   : > { %647 = vmatprep.mubr.f32.mxu0 %v556_v26  ;;  %2931 = vst [vmem:[#allocation38_spill] sm:$0xff] %v2290_v47  ;;  %v2295_v24 = vld [vmem:[%s2843_s3 + $0x238] sm:$0xff] }
  0xfd   : > { %v1395_v2 = vpack.c.bf16 %v546_v55, %v544_v30  ;;  %v462_v27 = vpop.permute.xlu1 %461  ;;  %v460_v1 = vpop.permute.xlu0 %459  ;;  %v1393_v7 = vpack.c.bf16 %v547_v56, %v545_v8  ;;  %2932 = vst [vmem:[#allocation39_spill] sm:$0xff] %v2295_v24  ;;  %v2300_v8 = vld [vmem:[%s2843_s3 + $0x220] sm:$0xff]  ;;  %v558_v30 = vld [vmem:[%s2841_s1 + $0x30] sm:$0xff] }
  0xfe   : > { %2933 = vst [vmem:[#allocation40_spill] sm:$0xff] %v2300_v8 }
  0xff   : > { %648 = vmatmul.mubr.f32.gmra.mrb[2].mxu0 %v555_v59  ;;  %1394 = vmatprep.subr.bf16.mxu0 %v1393_v7  ;;  %v2305_v7 = vld [vmem:[%s2843_s3 + $0x228] sm:$0xff] }
 0x100   : > { %1396 = vmatpush1.bf16.msra.mxu0 %v1395_v2  ;;  %2934 = vst [vmem:[#allocation41_spill] sm:$0xff] %v2305_v7  ;;  %653 = vmatprep.mubr.f32.mxu0 %v559_v43 }
 0x101   : > { %v470_v26 = vpop.permute.xlu1 %469  ;;  %v468_v48 = vpop.permute.xlu0 %467 }
 0x102   : > { %v475_v53 = vsel %vm471_vm7, %v462_v27, %v470_v26  ;;  %v479_v54 = vsel %vm471_vm7, %v470_v26, %v462_v27  ;;  %v474_v55 = vsel %vm471_vm7, %v460_v1, %v468_v48  ;;  %v478_v56 = vsel %vm471_vm7, %v468_v48, %v460_v1  ;;  %v561_v27 = vld [vmem:[%s2841_s1 + $0x48] sm:$0xff]  ;;  %v554_v48 = vld [vmem:[%s2841_s1 + $0x10] sm:$0xff] }
 0x103   : > { %v550_v59 = vmul.f32 %v475_v53, %v2290_v47  ;;  %v551_v2 = vmul.f32 %v479_v54, %v2295_v24  ;;  %v548_v43 = vmul.f32 %v474_v55, %v2300_v8  ;;  %v549_v57 = vmul.f32 %v478_v56, %v2305_v7  ;;  %654 = vmatmul.mubr.f32.gmra.mrb[4].mxu0 %v558_v30  ;;  %v557_v30 = vld [vmem:[%s2841_s1 + $0x28] sm:$0xff] }
 0x104   : > { %659 = vmatprep.mubr.f32.mxu0 %v562_v4  ;;  %v2869_v1 = vmov 0.0  }
 0x105   : > { %v1399_v26 = vpack.c.bf16 %v550_v59, %v548_v43  ;;  %v1397_v0 = vpack.c.bf16 %v551_v2, %v549_v57  ;;  %v563_v57 = vld [vmem:[%s2841_s1 + $0x58] sm:$0xff] }
 0x107   : > { %660 = vmatmul.mubr.f32.gmra.mrb[6].mxu0 %v561_v27  ;;  %1398 = vmatprep.subr.bf16.mxu0 %v1397_v0  ;;  %v560_v0 = vld [vmem:[%s2841_s1 + $0x40] sm:$0xff] }
 0x108   : > { %1400 = vmatpush1.bf16.msra.mxu0 %v1399_v26  ;;  %730 = vmatprep.mubr.f32.mxu0 %v2869_v1 }
 0x10b   : > { %1317 = vmatmul.mubr.msk.f32.vlgmr.msra.gmra.mrb[0].mxu0 %vm564_vm8, %v554_v48 }
 0x10c   : > { %736 = vmatprep.mubr.f32.mxu0 %v2869_v1 }
 0x10f   : > { %1318 = vmatmul.mubr.msk.f32.gmra.mrb[2].mxu0 %vm564_vm8, %v557_v30 }
 0x110   : > { %742 = vmatprep.mubr.f32.mxu0 %v2869_v1 }
 0x113   : > { %1319 = vmatmul.mubr.msk.f32.gmra.mrb[4].mxu0 %vm564_vm8, %v560_v0 }
 0x114   : > { %748 = vmatprep.mubr.f32.mxu0 %v2869_v1 }
 0x117   : > { %1320 = vmatmul.mubr.msk.f32.gmra.mrb[6].mxu0 %vm564_vm8, %v563_v57 }
 0x1de   : > { %v732_v4 = vpop.f32.mrb[0].mxu0 }
 0x1df   : > { %v2348_v53 = vmax.f32 %v732_v4, 0.0  ;;  %v734_v54 = vpop.f32.mrb[1].mxu0 }
 0x1e0   : > { %v2370_v48 = vmax.f32 %v734_v54, 0.0 }
 0x1e1   : > { %2935 = vst [vmem:[#allocation42_spill] sm:$0xff] %v2348_v53  ;;  %763 = vrot.lane.b32.xlu0 %v2348_v53, %s1522_s21 }
 0x1e2   : > { %v738_v55 = vpop.f32.mrb[2].mxu0  ;;  %2937 = vst [vmem:[#allocation44_spill] sm:$0xff] %v2370_v48 }
 0x1e3   : > { %v2352_v56 = vmax.f32 %v738_v55, 0.0  ;;  %v740_v59 = vpop.f32.mrb[3].mxu0  ;;  %v1028_v55 = vld [vmem:[%s2842_s2 + $0x8] sm:$0xff] }
 0x1e4   : > { %v2376_v30 = vmax.f32 %v740_v59, 0.0  ;;  %1115 = vmatprep.mubr.f32.mxu1 %v1028_v55 }
 0x1e5   : > { %2936 = vst [vmem:[#allocation43_spill] sm:$0xff] %v2352_v56  ;;  %787 = vrot.lane.b32.xlu0 %v2348_v53, %s1523_s22  ;;  %765 = vrot.lane.b32.xlu1 %v2352_v56, %s1522_s21 }
 0x1e6   : > { %v744_v2 = vpop.f32.mrb[4].mxu0  ;;  %2938 = vst [vmem:[#allocation45_spill] sm:$0xff] %v2376_v30 }
 0x1e7   : > { %v746_v43 = vpop.f32.mrb[5].mxu0  ;;  %v2390_v0 = vmax.f32 %v744_v2, 0.0 }
 0x1e8   : > { %v2410_v4 = vmax.f32 %v746_v43, 0.0 }
 0x1e9   : > { %811 = vrot.lane.b32.xlu0 %v2348_v53, %s1524_s23  ;;  %789 = vrot.lane.b32.xlu1 %v2352_v56, %s1523_s22  ;;  %2939 = vst [vmem:[#allocation46_spill] sm:$0xff] %v2390_v0 }
 0x1ea   : > { %v750_v27 = vpop.f32.mrb[6].mxu0  ;;  %2941 = vst [vmem:[#allocation48_spill] sm:$0xff] %v2410_v4 }
 0x1eb   : > { %v752_v26 = vpop.f32.mrb[7].mxu0  ;;  %v2396_v57 = vmax.f32 %v750_v27, 0.0 }
 0x1ec   : > { %v2416_v54 = vmax.f32 %v752_v26, 0.0 }
 0x1ed   : > { %835 = vrot.lane.b32.xlu0 %v2348_v53, %s1525_s24  ;;  %813 = vrot.lane.b32.xlu1 %v2352_v56, %s1524_s23  ;;  %2940 = vst [vmem:[#allocation47_spill] sm:$0xff] %v2396_v57 }
 0x1ee   : > { %2942 = vst [vmem:[#allocation49_spill] sm:$0xff] %v2416_v54 }
 0x1f1   : > { %859 = vrot.lane.b32.xlu0 %v2348_v53, %s1526_s25  ;;  %837 = vrot.lane.b32.xlu1 %v2352_v56, %s1525_s24 }
 0x1f5   : > { %771 = vrot.lane.b32.xlu0 %v2370_v48, %s1522_s21  ;;  %861 = vrot.lane.b32.xlu1 %v2352_v56, %s1526_s25 }
 0x1f9   : > { %795 = vrot.lane.b32.xlu0 %v2370_v48, %s1523_s22  ;;  %773 = vrot.lane.b32.xlu1 %v2376_v30, %s1522_s21 }
 0x1fd   : > { %819 = vrot.lane.b32.xlu0 %v2370_v48, %s1524_s23  ;;  %797 = vrot.lane.b32.xlu1 %v2376_v30, %s1523_s22 }
 0x201   : > { %843 = vrot.lane.b32.xlu0 %v2370_v48, %s1525_s24  ;;  %821 = vrot.lane.b32.xlu1 %v2376_v30, %s1524_s23 }
 0x205   : > { %845 = vrot.lane.b32.xlu1 %v2376_v30, %s1525_s24  ;;  %767 = vrot.lane.b32.xlu0 %v2390_v0, %s1522_s21 }
 0x209   : > { %791 = vrot.lane.b32.xlu0 %v2390_v0, %s1523_s22  ;;  %769 = vrot.lane.b32.xlu1 %v2396_v57, %s1522_s21 }
 0x20d   : > { %815 = vrot.lane.b32.xlu0 %v2390_v0, %s1524_s23  ;;  %793 = vrot.lane.b32.xlu1 %v2396_v57, %s1523_s22 }
 0x211   : > { %839 = vrot.lane.b32.xlu0 %v2390_v0, %s1525_s24  ;;  %817 = vrot.lane.b32.xlu1 %v2396_v57, %s1524_s23 }
 0x215   : > { %775 = vrot.lane.b32.xlu0 %v2410_v4, %s1522_s21  ;;  %841 = vrot.lane.b32.xlu1 %v2396_v57, %s1525_s24 }
 0x219   : > { %867 = vrot.lane.b32.xlu0 %v2370_v48, %s1526_s25  ;;  %777 = vrot.lane.b32.xlu1 %v2416_v54, %s1522_s21 }
 0x21d   : > { %799 = vrot.lane.b32.xlu0 %v2410_v4, %s1523_s22  ;;  %869 = vrot.lane.b32.xlu1 %v2376_v30, %s1526_s25 }
 0x221   : > { %823 = vrot.lane.b32.xlu0 %v2410_v4, %s1524_s23  ;;  %801 = vrot.lane.b32.xlu1 %v2416_v54, %s1523_s22 }
 0x225   : > { %847 = vrot.lane.b32.xlu0 %v2410_v4, %s1525_s24  ;;  %865 = vrot.lane.b32.xlu1 %v2396_v57, %s1526_s25 }
 0x229   : > { %863 = vrot.lane.b32.xlu0 %v2390_v0, %s1526_s25  ;;  %825 = vrot.lane.b32.xlu1 %v2416_v54, %s1524_s23 }
 0x22d   : > { %871 = vrot.lane.b32.xlu0 %v2410_v4, %s1526_s25  ;;  %885 = vrot.lane.b32.xlu1 %v2352_v56, %s1527_s26 }
 0x231   : > { %883 = vrot.lane.b32.xlu0 %v2348_v53, %s1527_s26  ;;  %849 = vrot.lane.b32.xlu1 %v2416_v54, %s1525_s24 }
 0x235   : > { %891 = vrot.lane.b32.xlu0 %v2370_v48, %s1527_s26  ;;  %893 = vrot.lane.b32.xlu1 %v2376_v30, %s1527_s26 }
 0x239   : > { %887 = vrot.lane.b32.xlu0 %v2390_v0, %s1527_s26  ;;  %889 = vrot.lane.b32.xlu1 %v2396_v57, %s1527_s26 }
 0x23d   : > { %895 = vrot.lane.b32.xlu0 %v2410_v4, %s1527_s26  ;;  %909 = vrot.lane.b32.xlu1 %v2352_v56, %s1528_s27 }
 0x241   : > { %907 = vrot.lane.b32.xlu0 %v2348_v53, %s1528_s27  ;;  %873 = vrot.lane.b32.xlu1 %v2416_v54, %s1526_s25  ;;  %s2820_s25 = scalar_lea.vmem %s2844_s4, %s1327_s17 }
 0x245   : > { %915 = vrot.lane.b32.xlu0 %v2370_v48, %s1528_s27  ;;  %917 = vrot.lane.b32.xlu1 %v2376_v30, %s1528_s27 }
 0x249   : > { %911 = vrot.lane.b32.xlu0 %v2390_v0, %s1528_s27  ;;  %897 = vrot.lane.b32.xlu1 %v2416_v54, %s1527_s26 }
 0x24d   : > { %919 = vrot.lane.b32.xlu0 %v2410_v4, %s1528_s27  ;;  %913 = vrot.lane.b32.xlu1 %v2396_v57, %s1528_s27 }
 0x251   : > { %931 = vrot.lane.b32.xlu0 %v2348_v53, %s1529_s30  ;;  %921 = vrot.lane.b32.xlu1 %v2416_v54, %s1528_s27 }
 0x253   : > { %v764_v59 = vpop.permute.xlu0 %763 }
 0x255   : > { %939 = vrot.lane.b32.xlu0 %v2370_v48, %s1529_s30  ;;  %933 = vrot.lane.b32.xlu1 %v2352_v56, %s1529_s30 }
 0x257   : > { %v788_v2 = vpop.permute.xlu0 %787  ;;  %v766_v43 = vpop.permute.xlu1 %765 }
 0x259   : > { %935 = vrot.lane.b32.xlu0 %v2390_v0, %s1529_s30  ;;  %941 = vrot.lane.b32.xlu1 %v2376_v30, %s1529_s30 }
 0x25b   : > { %v2489_v27 = vpop.permute.xlu0 %811  ;;  %v790_v26 = vpop.permute.xlu1 %789 }
 0x25d   : > { %943 = vrot.lane.b32.xlu0 %v2410_v4, %s1529_s30  ;;  %937 = vrot.lane.b32.xlu1 %v2396_v57, %s1529_s30 }
 0x25f   : > { %v2495_v55 = vpop.permute.xlu0 %835  ;;  %v2497_v1 = vpop.permute.xlu1 %813 }
 0x261   : > { %945 = vrot.lane.b32.xlu1 %v2416_v54, %s1529_s30 }
 0x263   : > { %v860_v24 = vpop.permute.xlu0 %859  ;;  %v2501_v47 = vpop.permute.xlu1 %837 }
 0x267   : > { %v772_v7 = vpop.permute.xlu0 %771  ;;  %v862_v8 = vpop.permute.xlu1 %861 }
 0x268   : > { %v779_v58 = vsel %vm296_vm0, %v764_v59, %v772_v7  ;;  %v783_v25 = vsel %vm296_vm0, %v772_v7, %v764_v59 }
 0x269   : > { %v955_v53 = vmul.f32 %v783_v25, %v1741_v17  ;;  %v956_v54 = vmul.f32 %v779_v58, %v1727_v13 }
 0x26b   : > { %v796_v0 = vpop.permute.xlu0 %795  ;;  %v774_v57 = vpop.permute.xlu1 %773 }
 0x26c   : > { %v780_v4 = vsel %vm296_vm0, %v766_v43, %v774_v57  ;;  %v784_v44 = vsel %vm296_vm0, %v774_v57, %v766_v43  ;;  %v807_v43 = vsel %vm321_vm1, %v796_v0, %v788_v2 }
 0x26d   : > { %v957_v28 = vmul.f32 %v784_v44, %v1746_v18  ;;  %v958_v45 = vmul.f32 %v780_v4, %v1736_v16 }
 0x26f   : > { %v2515_v56 = vpop.permute.xlu0 %819  ;;  %v798_v29 = vpop.permute.xlu1 %797  ;;  %v1401_v7 = vpack.c.bf16 %v958_v45, %v956_v54  ;;  %v1403_v59 = vpack.c.bf16 %v957_v28, %v955_v53  ;;  %v803_v54 = vsel %vm321_vm1, %v788_v2, %v796_v0 }
 0x270   : > { %v804_v28 = vsel %vm321_vm1, %v790_v26, %v798_v29  ;;  %v808_v20 = vsel %vm321_vm1, %v798_v29, %v790_v26  ;;  %v964_v2 = vmul.f32 %v803_v54, %v1815_v52  ;;  %v963_v26 = vmul.f32 %v807_v43, %v1810_v51 }
 0x271   : > { %1402 = vmatprep.subr.bf16.mxu1 %v1401_v7  ;;  %v966_v23 = vmul.f32 %v804_v28, %v1805_v50 }
 0x272   : > { %1404 = vmatpush1.bf16.msra.mxu1 %v1403_v59 }
 0x273   : > { %v2517_v48 = vpop.permute.xlu0 %843  ;;  %v822_v9 = vpop.permute.xlu1 %821 }
 0x277   : > { %v2519_v21 = vpop.permute.xlu1 %845  ;;  %v768_v57 = vpop.permute.xlu0 %767 }
 0x27b   : > { %v792_v17 = vpop.permute.xlu0 %791  ;;  %v770_v25 = vpop.permute.xlu1 %769 }
 0x27f   : > { %v2521_v18 = vpop.permute.xlu0 %815  ;;  %v794_v13 = vpop.permute.xlu1 %793 }
 0x283   : > { %v2523_v44 = vpop.permute.xlu0 %839  ;;  %v2525_v16 = vpop.permute.xlu1 %817 }
 0x287   : > { %v776_v58 = vpop.permute.xlu0 %775  ;;  %v2527_v45 = vpop.permute.xlu1 %841 }
 0x288   : > { %v781_v53 = vsel %vm296_vm0, %v768_v57, %v776_v58  ;;  %v785_v4 = vsel %vm296_vm0, %v776_v58, %v768_v57 }
 0x289   : > { %v959_v57 = vmul.f32 %v785_v4, %v1777_v33  ;;  %v960_v58 = vmul.f32 %v781_v53, %v1782_v34 }
 0x28b   : > { %v868_v7 = vpop.permute.xlu0 %867  ;;  %v778_v59 = vpop.permute.xlu1 %777 }
 0x28c   : > { %v782_v22 = vsel %vm296_vm0, %v770_v25, %v778_v59  ;;  %v786_v30 = vsel %vm296_vm0, %v778_v59, %v770_v25  ;;  %v875_v29 = vsel %vm396_vm4, %v860_v24, %v868_v7  ;;  %v879_v50 = vsel %vm396_vm4, %v868_v7, %v860_v24 }
 0x28d   : > { %v961_v11 = vmul.f32 %v786_v30, %v1767_v31  ;;  %v962_v0 = vmul.f32 %v782_v22, %v1772_v32  ;;  %v965_v25 = vmul.f32 %v808_v20, %v1799_v49  ;;  %v828_v31 = vsel %vm346_vm2, %v2497_v1, %v822_v9 }
 0x28e   : > { %v1409_v22 = vpack.c.bf16 %v966_v23, %v964_v2  ;;  %v2565_v24 = vmul.f32 %v875_v29, %v2070_v5  ;;  %v2568_v49 = vmul.f32 %v879_v50, %v2052_v6  ;;  %v827_v23 = vsel %vm346_vm2, %v2489_v27, %v2515_v56 }
 0x28f   : > { %v800_v28 = vpop.permute.xlu0 %799  ;;  %v870_v33 = vpop.permute.xlu1 %869  ;;  %v1405_v4 = vpack.c.bf16 %v962_v0, %v960_v58  ;;  %v1407_v34 = vpack.c.bf16 %v961_v11, %v959_v57  ;;  %v1411_v5 = vpack.c.bf16 %v965_v25, %v963_v26  ;;  %v974_v53 = vmul.f32 %v828_v31, %v1870_v39 }
 0x290   : > { %v876_v32 = vsel %vm396_vm4, %v862_v8, %v870_v33  ;;  %v880_v52 = vsel %vm396_vm4, %v870_v33, %v862_v8  ;;  %v805_v20 = vsel %vm321_vm1, %v792_v17, %v800_v28  ;;  %v809_v8 = vsel %vm321_vm1, %v800_v28, %v792_v17 }
 0x291   : > { %v2571_v51 = vmul.f32 %v876_v32, %v2061_v46  ;;  %v2574_v11 = vmul.f32 %v880_v52, %v2047_v3  ;;  %1406 = vmatprep.subr.bf16.mxu1 %v1405_v4  ;;  %v832_v17 = vsel %vm346_vm2, %v822_v9, %v2497_v1  ;;  %v967_v7 = vmul.f32 %v809_v8, %v1842_v15 }
 0x292   : > { %1408 = vmatpush1.bf16.msra.mxu1 %v1407_v34  ;;  %v968_v59 = vmul.f32 %v805_v20, %v1847_v19  ;;  %v831_v9 = vsel %vm346_vm2, %v2515_v56, %v2489_v27  ;;  %v972_v39 = vmul.f32 %v827_v23, %v1880_v41  ;;  %v973_v1 = vmul.f32 %v832_v17, %v1864_v38  ;;  %v2944_v20 = vld [vmem:[#allocation45_spill] sm:$0xff]  ;;  %v2945_v23 = vld [vmem:[#allocation6_spill] sm:$0xff] }
 0x293   : > { %v824_v6 = vpop.permute.xlu0 %823  ;;  %1410 = vmatprep.subr.bf16.mxu1 %v1409_v22  ;;  %v802_v46 = vpop.permute.xlu1 %801  ;;  %v1441_v3 = vpack.c.bf16 %v2574_v11, %v2568_v49  ;;  %v1443_v30 = vpack.c.bf16 %v2571_v51, %v2565_v24  ;;  %v971_v19 = vmul.f32 %v831_v9, %v1875_v40  ;;  %v851_v40 = vsel %vm371_vm3, %v2495_v55, %v2517_v48  ;;  %v2943_v22 = vld [vmem:[#allocation3_spill] sm:$0xff]  ;;  %v2950_v9 = vld [vmem:[#allocation44_spill] sm:$0xff]  ;;  %v2967_v49 = vld [vmem:[#allocation14_spill] sm:$0xff] }
 0x294   : > { %v806_v54 = vsel %vm321_vm1, %v794_v13, %v802_v46  ;;  %v810_v43 = vsel %vm321_vm1, %v802_v46, %v794_v13  ;;  %v829_v41 = vsel %vm346_vm2, %v2521_v18, %v824_v6  ;;  %v833_v38 = vsel %vm346_vm2, %v824_v6, %v2521_v18  ;;  %v2946_v46 = vld [vmem:[#allocation7_spill] sm:$0xff] }
 0x295   : > { %v969_v57 = vmul.f32 %v810_v43, %v1832_v12  ;;  %v970_v58 = vmul.f32 %v806_v54, %v1837_v14  ;;  %v852_v12 = vsel %vm371_vm3, %v2501_v47, %v2519_v21  ;;  %v1417_v14 = vpack.c.bf16 %v974_v53, %v972_v39  ;;  %v2948_v53 = vld [vmem:[#allocation5_spill] sm:$0xff] }
 0x296   : > { %1412 = vmatpush1.bf16.msra.mxu1 %v1411_v5  ;;  %v1419_v29 = vpack.c.bf16 %v973_v1, %v971_v19  ;;  %v856_v50 = vsel %vm371_vm3, %v2519_v21, %v2501_v47  ;;  %v982_v26 = vmul.f32 %v852_v12, %v1935_v36  ;;  %v975_v28 = vmul.f32 %v833_v38, %v1907_v62  ;;  %v2947_v5 = vld [vmem:[#allocation4_spill] sm:$0xff]  ;;  %v2951_v39 = vld [vmem:[#allocation9_spill] sm:$0xff]  ;;  %v2952_v1 = vld [vmem:[#allocation43_spill] sm:$0xff] }
 0x297   : > { %v848_v0 = vpop.permute.xlu0 %847  ;;  %v2606_v13 = vpop.permute.xlu1 %865  ;;  %v1413_v15 = vpack.c.bf16 %v970_v58, %v968_v59  ;;  %v1415_v2 = vpack.c.bf16 %v969_v57, %v967_v7  ;;  %v976_v33 = vmul.f32 %v829_v41, %v1912_v63  ;;  %v855_v36 = vsel %vm371_vm3, %v2517_v48, %v2495_v55  ;;  %v2949_v58 = vld [vmem:[#allocation2_spill] sm:$0xff]  ;;  %v2954_v19 = vld [vmem:[#allocation49_spill] sm:$0xff] }
 0x298   : > { %v980_v21 = vmul.f32 %v851_v40, %v1945_v42  ;;  %v981_v62 = vmul.f32 %v856_v50, %v1929_v35  ;;  %v857_v48 = vsel %vm371_vm3, %v848_v0, %v2523_v44  ;;  %v990_v8 = vmul.f32 %v2944_v20, %v2943_v22  ;;  %v2956_v41 = vld [vmem:[#allocation42_spill] sm:$0xff]  ;;  %v2958_v50 = vld [vmem:[#allocation48_spill] sm:$0xff] }
 0x299   : > { %1414 = vmatprep.subr.bf16.mxu1 %v1413_v15  ;;  %v983_v6 = vmul.f32 %v857_v48, %v2945_v23 }
 0x29a   : > { %1416 = vmatpush1.bf16.msra.mxu1 %v1415_v2  ;;  %v1425_v63 = vpack.c.bf16 %v982_v26, %v980_v21  ;;  %v2953_v2 = vld [vmem:[#allocation11_spill] sm:$0xff] }
 0x29b   : > { %v2623_v56 = vpop.permute.xlu0 %863  ;;  %1418 = vmatprep.subr.bf16.mxu1 %v1417_v14  ;;  %v826_v27 = vpop.permute.xlu1 %825  ;;  %v994_v12 = vmul.f32 %v2954_v19, %v2953_v2  ;;  %v2955_v14 = vld [vmem:[#allocation8_spill] sm:$0xff] }
 0x29c   : > { %v830_v18 = vsel %vm346_vm2, %v2525_v16, %v826_v27  ;;  %v834_v25 = vsel %vm346_vm2, %v826_v27, %v2525_v16  ;;  %v987_v38 = vmul.f32 %v2956_v41, %v2955_v14 }
 0x29d   : > { %v977_v4 = vmul.f32 %v834_v25, %v1897_v60  ;;  %v978_v34 = vmul.f32 %v830_v18, %v1902_v61  ;;  %v979_v60 = vmul.f32 %v855_v36, %v1940_v37  ;;  %v853_v61 = vsel %vm371_vm3, %v2523_v44, %v848_v0  ;;  %v2959_v25 = vld [vmem:[#allocation13_spill] sm:$0xff]  ;;  %v2962_v36 = vld [vmem:[#allocation46_spill] sm:$0xff] }
 0x29e   : > { %1420 = vmatpush1.bf16.msra.mxu1 %v1419_v29  ;;  %v984_v44 = vmul.f32 %v853_v61, %v2946_v46  ;;  %v989_v0 = vmul.f32 %v2952_v1, %v2951_v39  ;;  %v2957_v29 = vld [vmem:[#allocation10_spill] sm:$0xff]  ;;  %v2972_v39 = vld [vmem:[#allocation25_spill] sm:$0xff] }
 0x29f   : > { %v872_v47 = vpop.permute.xlu0 %871  ;;  %v886_v31 = vpop.permute.xlu1 %885  ;;  %v1421_v32 = vpack.c.bf16 %v978_v34, %v976_v33  ;;  %v1423_v16 = vpack.c.bf16 %v977_v4, %v975_v28  ;;  %v1427_v52 = vpack.c.bf16 %v981_v62, %v979_v60  ;;  %v992_v26 = vmul.f32 %v2958_v50, %v2957_v29  ;;  %v2960_v28 = vld [vmem:[#allocation47_spill] sm:$0xff]  ;;  %v2961_v34 = vld [vmem:[#allocation12_spill] sm:$0xff] }
 0x2a0   : > { %v1435_v18 = vpack.c.bf16 %v989_v0, %v987_v38  ;;  %v993_v33 = vmul.f32 %v2960_v28, %v2959_v25  ;;  %v991_v21 = vmul.f32 %v2962_v36, %v2961_v34  ;;  %v877_v62 = vsel %vm396_vm4, %v2623_v56, %v872_v47  ;;  %v2973_v38 = vld [vmem:[#allocation29_spill] sm:$0xff]  ;;  %v2974_v29 = vld [vmem:[#allocation27_spill] sm:$0xff] }
 0x2a1   : > { %1422 = vmatprep.subr.bf16.mxu1 %v1421_v32  ;;  %v1437_v4 = vpack.c.bf16 %v994_v12, %v992_v26  ;;  %v2975_v26 = vld [vmem:[#allocation22_spill] sm:$0xff]  ;;  %v2976_v25 = vld [vmem:[#allocation23_spill] sm:$0xff] }
 0x2a2   : > { %1424 = vmatpush1.bf16.msra.mxu1 %v1423_v16  ;;  %v1439_v60 = vpack.c.bf16 %v993_v33, %v991_v21  ;;  %v2977_v21 = vld [vmem:[#allocation28_spill] sm:$0xff] }
 0x2a3   : > { %v884_v42 = vpop.permute.xlu0 %883  ;;  %1426 = vmatprep.subr.bf16.mxu1 %v1425_v63  ;;  %v850_v55 = vpop.permute.xlu1 %849  ;;  %v881_v63 = vsel %vm396_vm4, %v872_v47, %v2623_v56 }
 0x2a4   : > { %v854_v35 = vsel %vm371_vm3, %v2527_v45, %v850_v55  ;;  %v858_v37 = vsel %vm371_vm3, %v850_v55, %v2527_v45  ;;  %v988_v45 = vmul.f32 %v2950_v9, %v2949_v58  ;;  %v2963_v55 = vld [vmem:[#allocation16_spill] sm:$0xff] }
 0x2a5   : > { %v985_v17 = vmul.f32 %v858_v37, %v2947_v5  ;;  %v986_v54 = vmul.f32 %v854_v35, %v2948_v53  ;;  %v999_v35 = vmul.f32 %v877_v62, %v2963_v55  ;;  %v2964_v37 = vld [vmem:[#allocation17_spill] sm:$0xff]  ;;  %v2970_v53 = vld [vmem:[#allocation18_spill] sm:$0xff] }
 0x2a6   : > { %1428 = vmatpush1.bf16.msra.mxu1 %v1427_v52  ;;  %v1433_v15 = vpack.c.bf16 %v990_v8, %v988_v45  ;;  %v1000_v52 = vmul.f32 %v881_v63, %v2964_v37 }
 0x2a7   : > { %v892_v43 = vpop.permute.xlu0 %891  ;;  %v894_v7 = vpop.permute.xlu1 %893  ;;  %v1429_v59 = vpack.c.bf16 %v986_v54, %v984_v44  ;;  %v1431_v57 = vpack.c.bf16 %v985_v17, %v983_v6  ;;  %v2965_v6 = vld [vmem:[#allocation21_spill] sm:$0xff]  ;;  %v2966_v44 = vld [vmem:[#allocation19_spill] sm:$0xff] }
 0x2a8   : > { %v903_v61 = vsel %vm421_vm5, %v892_v43, %v884_v42  ;;  %v904_v48 = vsel %vm421_vm5, %v894_v7, %v886_v31  ;;  %v899_v56 = vsel %vm421_vm5, %v884_v42, %v892_v43  ;;  %v900_v47 = vsel %vm421_vm5, %v886_v31, %v894_v7  ;;  %v2969_v31 = vld [vmem:[#allocation20_spill] sm:$0xff] }
 0x2a9   : > { %1430 = vmatprep.subr.bf16.mxu1 %v1429_v59  ;;  %v1004_v46 = vmul.f32 %v903_v61, %v2965_v6  ;;  %v1006_v5 = vmul.f32 %v904_v48, %v2966_v44  ;;  %v1003_v42 = vmul.f32 %v899_v56, %v2969_v31  ;;  %v1005_v54 = vmul.f32 %v900_v47, %v2970_v53  ;;  %v2981_v47 = vld [vmem:[#allocation30_spill] sm:$0xff] }
 0x2aa   : > { %1432 = vmatpush1.bf16.msra.mxu1 %v1431_v57  ;;  %v1031_v53 = vld [vmem:[%s2842_s2 + $0x20] sm:$0xff] }
 0x2ab   : > { %v888_v40 = vpop.permute.xlu0 %887  ;;  %1434 = vmatprep.subr.bf16.mxu1 %v1433_v15  ;;  %v890_v27 = vpop.permute.xlu1 %889  ;;  %v1449_v9 = vpack.c.bf16 %v1006_v5, %v1004_v46  ;;  %v1451_v2 = vpack.c.bf16 %v1005_v54, %v1003_v42 }
 0x2ae   : > { %1436 = vmatpush1.bf16.msra.mxu1 %v1435_v18 }
 0x2af   : > { %v896_v32 = vpop.permute.xlu0 %895  ;;  %v910_v16 = vpop.permute.xlu1 %909  ;;  %1438 = vmatprep.subr.bf16.mxu1 %v1437_v4 }
 0x2b0   : > { %v901_v57 = vsel %vm421_vm5, %v888_v40, %v896_v32  ;;  %v905_v58 = vsel %vm421_vm5, %v896_v32, %v888_v40 }
 0x2b1   : > { %v1008_v1 = vmul.f32 %v905_v58, %v2972_v39  ;;  %v2985_v58 = vld [vmem:[#allocation34_spill] sm:$0xff] }
 0x2b2   : > { %1440 = vmatpush1.bf16.msra.mxu1 %v1439_v60 }
 0x2b3   : > { %v908_v22 = vpop.permute.xlu0 %907  ;;  %v874_v20 = vpop.permute.xlu1 %873  ;;  %1442 = vmatprep.subr.bf16.mxu1 %v1441_v3  ;;  %v2968_v3 = vld [vmem:[#allocation15_spill] sm:$0xff] }
 0x2b4   : > { %v878_v8 = vsel %vm396_vm4, %v2606_v13, %v874_v20  ;;  %v882_v23 = vsel %vm396_vm4, %v874_v20, %v2606_v13  ;;  %v2980_v20 = vld [vmem:[#allocation33_spill] sm:$0xff] }
 0x2b5   : > { %v1001_v11 = vmul.f32 %v878_v8, %v2967_v49  ;;  %v1002_v17 = vmul.f32 %v882_v23, %v2968_v3  ;;  %v2982_v23 = vld [vmem:[#allocation31_spill] sm:$0xff] }
 0x2b6   : > { %1444 = vmatpush1.bf16.msra.mxu1 %v1443_v30  ;;  %v2971_v30 = vld [vmem:[#allocation24_spill] sm:$0xff] }
 0x2b7   : > { %v916_v43 = vpop.permute.xlu0 %915  ;;  %v918_v7 = vpop.permute.xlu1 %917  ;;  %v1445_v59 = vpack.c.bf16 %v1002_v17, %v1000_v52  ;;  %v1447_v13 = vpack.c.bf16 %v1001_v11, %v999_v35  ;;  %v1007_v45 = vmul.f32 %v901_v57, %v2971_v30  ;;  %v2979_v52 = vld [vmem:[#allocation32_spill] sm:$0xff]  ;;  %v1027_v17 = vld [vmem:[%s2842_s2] sm:$0xff]  ;;  %v1030_v30 = vld [vmem:[%s2842_s2 + $0x18] sm:$0xff] }
 0x2b8   : > { %v927_v24 = vsel %vm446_vm6, %v916_v43, %v908_v22  ;;  %v928_v51 = vsel %vm446_vm6, %v918_v7, %v910_v16  ;;  %v923_v19 = vsel %vm446_vm6, %v908_v22, %v916_v43  ;;  %v924_v12 = vsel %vm446_vm6, %v910_v16, %v918_v7  ;;  %v2978_v16 = vld [vmem:[#allocation26_spill] sm:$0xff]  ;;  %v2983_v7 = vld [vmem:[#allocation36_spill] sm:$0xff] }
 0x2b9   : > { %1446 = vmatprep.subr.bf16.mxu1 %v1445_v59  ;;  %v1012_v40 = vmul.f32 %v927_v24, %v2973_v38  ;;  %v1014_v50 = vmul.f32 %v928_v51, %v2974_v29  ;;  %v1011_v32 = vmul.f32 %v923_v19, %v2977_v21  ;;  %v1013_v62 = vmul.f32 %v924_v12, %v2978_v16  ;;  %v2986_v24 = vld [vmem:[#allocation35_spill] sm:$0xff]  ;;  %v1033_v12 = vld [vmem:[%s2842_s2 + $0x30] sm:$0xff] }
 0x2ba   : > { %1448 = vmatpush1.bf16.msra.mxu1 %v1447_v13  ;;  %v2984_v13 = vld [vmem:[#allocation37_spill] sm:$0xff]  ;;  %v2987_v29 = vld [vmem:[#allocation40_spill] sm:$0xff]  ;;  %v1032_v16 = vld [vmem:[%s2842_s2 + $0x28] sm:$0xff] }
 0x2bb   : > { %v912_v0 = vpop.permute.xlu0 %911  ;;  %v898_v15 = vpop.permute.xlu1 %897  ;;  %1450 = vmatprep.subr.bf16.mxu1 %v1449_v9  ;;  %v1457_v63 = vpack.c.bf16 %v1014_v50, %v1012_v40  ;;  %v1459_v37 = vpack.c.bf16 %v1013_v62, %v1011_v32  ;;  %v1029_v32 = vld [vmem:[%s2842_s2 + $0x10] sm:$0xff]  ;;  %v1035_v62 = vld [vmem:[%s2842_s2 + $0x40] sm:$0xff] }
 0x2bc   : > { %v902_v14 = vsel %vm421_vm5, %v890_v27, %v898_v15  ;;  %v906_v41 = vsel %vm421_vm5, %v898_v15, %v890_v27  ;;  %v1034_v15 = vld [vmem:[%s2842_s2 + $0x38] sm:$0xff] }
 0x2bd   : > { %v1009_v18 = vmul.f32 %v902_v14, %v2975_v26  ;;  %v1010_v28 = vmul.f32 %v906_v41, %v2976_v25  ;;  %v1037_v41 = vld [vmem:[%s2842_s2 + $0x50] sm:$0xff]  ;;  %v2988_v26 = vld [vmem:[#allocation41_spill] sm:$0xff]  ;;  %v2989_v25 = vld [vmem:[#allocation38_spill] sm:$0xff] }
 0x2be   : > { %1452 = vmatpush1.bf16.msra.mxu1 %v1451_v2 }
 0x2bf   : > { %v920_v33 = vpop.permute.xlu0 %919  ;;  %v914_v4 = vpop.permute.xlu1 %913  ;;  %v1453_v34 = vpack.c.bf16 %v1010_v28, %v1008_v1  ;;  %v1455_v36 = vpack.c.bf16 %v1009_v18, %v1007_v45 }
 0x2c0   : > { %v925_v27 = vsel %vm446_vm6, %v912_v0, %v920_v33  ;;  %v929_v60 = vsel %vm446_vm6, %v920_v33, %v912_v0  ;;  %v2990_v33 = vld [vmem:[#allocation39_spill] sm:$0xff] }
 0x2c1   : > { %1454 = vmatprep.subr.bf16.mxu1 %v1453_v34  ;;  %v1015_v22 = vmul.f32 %v925_v27, %v2979_v52  ;;  %v1016_v56 = vmul.f32 %v929_v60, %v2980_v20  ;;  %v1036_v34 = vld [vmem:[%s2842_s2 + $0x48] sm:$0xff]  ;;  %v1506_v60 = vld [vmem:[%s1572_s20] sm:$0xff]  ;;  %v1508_v20 = vld [vmem:[%s1572_s20 + $0x10] sm:$0xff] }
 0x2c2   : > { %1456 = vmatpush1.bf16.msra.mxu1 %v1455_v36 }
 0x2c3   : > { %v932_v61 = vpop.permute.xlu0 %931  ;;  %v922_v48 = vpop.permute.xlu1 %921  ;;  %1458 = vmatprep.subr.bf16.mxu1 %v1457_v63  ;;  %v1038_v63 = vld [vmem:[%s2842_s2 + $0x58] sm:$0xff] }
 0x2c4   : > { %v926_v55 = vsel %vm446_vm6, %v914_v4, %v922_v48  ;;  %v930_v35 = vsel %vm446_vm6, %v922_v48, %v914_v4 }
 0x2c5   : > { %v1017_v8 = vmul.f32 %v926_v55, %v2981_v47  ;;  %v1018_v6 = vmul.f32 %v930_v35, %v2982_v23  ;;  %v1507_v55 = vld [vmem:[%s1572_s20 + $0x8] sm:$0xff] }
 0x2c6   : > { %1460 = vmatpush1.bf16.msra.mxu1 %v1459_v37 }
 0x2c7   : > { %v940_v46 = vpop.permute.xlu0 %939  ;;  %v934_v44 = vpop.permute.xlu1 %933  ;;  %v1461_v5 = vpack.c.bf16 %v1018_v6, %v1016_v56  ;;  %v1463_v49 = vpack.c.bf16 %v1017_v8, %v1015_v22  ;;  %v1509_v8 = vld [vmem:[%s1572_s20 + $0x18] sm:$0xff] }
 0x2c8   : > { %v947_v11 = vsel %vm471_vm7, %v932_v61, %v940_v46  ;;  %v951_v3 = vsel %vm471_vm7, %v940_v46, %v932_v61 }
 0x2c9   : > { %1462 = vmatprep.subr.bf16.mxu1 %v1461_v5  ;;  %v1019_v59 = vmul.f32 %v947_v11, %v2983_v7  ;;  %v1020_v57 = vmul.f32 %v951_v3, %v2984_v13  ;;  %v1510_v5 = vld [vmem:[%s1572_s20 + $0x20] sm:$0xff]  ;;  %v1511_v3 = vld [vmem:[%s1572_s20 + $0x28] sm:$0xff] }
 0x2ca   : > { %1464 = vmatpush1.bf16.msra.mxu1 %v1463_v49 }
 0x2cb   : > { %v936_v31 = vpop.permute.xlu0 %935  ;;  %v942_v42 = vpop.permute.xlu1 %941 }
 0x2cc   : > { %v948_v54 = vsel %vm471_vm7, %v934_v44, %v942_v42  ;;  %v952_v43 = vsel %vm471_vm7, %v942_v42, %v934_v44 }
 0x2cd   : > { %v1021_v9 = vmul.f32 %v948_v54, %v2985_v58  ;;  %v1022_v51 = vmul.f32 %v952_v43, %v2986_v24  ;;  %1116 = vmatmul.mubr.f32.vlgmr.msra.gmra.mrb[0].mxu1 %v1027_v17  ;;  %v1512_v54 = vld [vmem:[%s1572_s20 + $0x30] sm:$0xff] }
 0x2ce   : > { %1121 = vmatprep.mubr.f32.mxu1 %v1031_v53 }
 0x2cf   : > { %v1467_v45 = vpack.c.bf16 %v1021_v9, %v1019_v59  ;;  %v944_v39 = vpop.permute.xlu0 %943  ;;  %v938_v1 = vpop.permute.xlu1 %937  ;;  %v1465_v0 = vpack.c.bf16 %v1022_v51, %v1020_v57  ;;  %v1513_v59 = vld [vmem:[%s1572_s20 + $0x38] sm:$0xff] }
 0x2d0   : > { %v949_v2 = vsel %vm471_vm7, %v936_v31, %v944_v39  ;;  %v953_v19 = vsel %vm471_vm7, %v944_v39, %v936_v31 }
 0x2d1   : > { %1122 = vmatmul.mubr.f32.gmra.mrb[2].mxu1 %v1030_v30  ;;  %1466 = vmatprep.subr.bf16.mxu1 %v1465_v0  ;;  %v1023_v50 = vmul.f32 %v949_v2, %v2987_v29  ;;  %v1024_v18 = vmul.f32 %v953_v19, %v2988_v26 }
 0x2d2   : > { %1468 = vmatpush1.bf16.msra.mxu1 %v1467_v45  ;;  %1127 = vmatprep.mubr.f32.mxu1 %v1034_v15 }
 0x2d3   : > { %v946_v14 = vpop.permute.xlu1 %945 }
 0x2d4   : > { %v950_v38 = vsel %vm471_vm7, %v938_v1, %v946_v14  ;;  %v954_v40 = vsel %vm471_vm7, %v946_v14, %v938_v1 }
 0x2d5   : > { %v1025_v28 = vmul.f32 %v950_v38, %v2989_v25  ;;  %v1026_v4 = vmul.f32 %v954_v40, %v2990_v33  ;;  %1128 = vmatmul.mubr.f32.gmra.mrb[4].mxu1 %v1033_v12 }
 0x2d6   : > { %1133 = vmatprep.mubr.f32.mxu1 %v1037_v41 }
 0x2d7   : > { %v1471_v36 = vpack.c.bf16 %v1025_v28, %v1023_v50  ;;  %v1469_v21 = vpack.c.bf16 %v1026_v4, %v1024_v18 }
 0x2d9   : > { %1134 = vmatmul.mubr.f32.gmra.mrb[6].mxu1 %v1036_v34  ;;  %1470 = vmatprep.subr.bf16.mxu1 %v1469_v21 }
 0x2da   : > { %1472 = vmatpush1.bf16.msra.mxu1 %v1471_v36  ;;  %1204 = vmatprep.mubr.f32.mxu1 %v2991_v10 }
 0x2dd   : > { %1321 = vmatmul.mubr.msk.f32.vlgmr.msra.gmra.mrb[0].mxu1 %vm564_vm8, %v1029_v32 }
 0x2de   : > { %1210 = vmatprep.mubr.f32.mxu1 %v2991_v10 }
 0x2e1   : > { %1322 = vmatmul.mubr.msk.f32.gmra.mrb[2].mxu1 %vm564_vm8, %v1032_v16 }
 0x2e2   : > { %1216 = vmatprep.mubr.f32.mxu1 %v2991_v10 }
 0x2e5   : > { %1323 = vmatmul.mubr.msk.f32.gmra.mrb[4].mxu1 %vm564_vm8, %v1035_v62 }
 0x2e6   : > { %1222 = vmatprep.mubr.f32.mxu1 %v2991_v10 }
 0x2e9   : > { %1324 = vmatmul.mubr.msk.f32.gmra.mrb[6].mxu1 %vm564_vm8, %v1038_v63 }
 0x3b0   : > { %v1206_v27 = vpop.f32.mrb[0].mxu1 }
 0x3b1   : > { %v1229_v61 = vadd.f32 %v1506_v60, %v1206_v27  ;;  %v1208_v48 = vpop.f32.mrb[1].mxu1 }
 0x3b2   : > { %v1230_v35 = vadd.f32 %v1507_v55, %v1208_v48 }
 0x3b3   : > { %v1237_v37 = vmax.f32 %v1229_v61, 0.0 }
 0x3b4   : > { %v1238_v52 = vmax.f32 %v1230_v35, 0.0  ;;  %v1212_v22 = vpop.f32.mrb[2].mxu1 }
 0x3b5   : > { %1245 = vst [vmem:[%s2820_s25] sm:$0xff] %v1237_v37  ;;  %v1231_v56 = vadd.f32 %v1508_v20, %v1212_v22  ;;  %v1214_v47 = vpop.f32.mrb[3].mxu1 }
 0x3b6   : > { %1246 = vst [vmem:[%s2820_s25 + $0x8] sm:$0xff] %v1238_v52  ;;  %v1232_v23 = vadd.f32 %v1509_v8, %v1214_v47 }
 0x3b7   : > { %v1239_v6 = vmax.f32 %v1231_v56, 0.0 }
 0x3b8   : > { %v1240_v46 = vmax.f32 %v1232_v23, 0.0  ;;  %v1218_v44 = vpop.f32.mrb[4].mxu1 }
 0x3b9   : > { %1247 = vst [vmem:[%s2820_s25 + $0x10] sm:$0xff] %v1239_v6  ;;  %v1233_v49 = vadd.f32 %v1510_v5, %v1218_v44  ;;  %v1220_v11 = vpop.f32.mrb[5].mxu1 }
 0x3ba   : > { %1248 = vst [vmem:[%s2820_s25 + $0x18] sm:$0xff] %v1240_v46  ;;  %v1234_v17 = vadd.f32 %v1511_v3, %v1220_v11 }
 0x3bb   : > { %v1241_v31 = vmax.f32 %v1233_v49, 0.0 }
 0x3bc   : > { %v1242_v42 = vmax.f32 %v1234_v17, 0.0  ;;  %v1224_v53 = vpop.f32.mrb[6].mxu1 }
 0x3bd   : > { %1249 = vst [vmem:[%s2820_s25 + $0x20] sm:$0xff] %v1241_v31  ;;  %v1235_v43 = vadd.f32 %v1512_v54, %v1224_v53  ;;  %v1226_v7 = vpop.f32.mrb[7].mxu1 }
 0x3be   : > { %1250 = vst [vmem:[%s2820_s25 + $0x28] sm:$0xff] %v1242_v42  ;;  %v1236_v13 = vadd.f32 %v1513_v59, %v1226_v7 }
 0x3bf   : > { %v1243_v57 = vmax.f32 %v1235_v43, 0.0 }
 0x3c0   : > { %v1244_v58 = vmax.f32 %v1236_v13, 0.0 }
 0x3c1   : > { %1251 = vst [vmem:[%s2820_s25 + $0x30] sm:$0xff] %v1243_v57 }
 0x3c2   : > { %1252 = vst [vmem:[%s2820_s25 + $0x38] sm:$0xff] %v1244_v58 }
 0x3c3 PF: > { %s14_s15 = sadd.s32 1, %s1520_s15  }
 0x3c4   : > { %p11_p4 = scmp.ge.s32.totalorder %s14_s15, 4  }
 0x3c6   :  { %13 = sbr.rel (!%p11_p4) target bundleno = 1 (0x1), region = 66 }

</bundles_post_ra>
